<compile_context>
chip_gen: v5e
topology: v5e:2x2
jax: 0.10.0
libtpu: 0.0.40
codegen_flags: <defaults>
</compile_context>

<pallas_src>
import functools

import numpy as np
import jax
import jax.numpy as jnp
from jax.experimental import pallas as pl
from jax.experimental.pallas import tpu as pltpu

BF16 = jnp.bfloat16
F32 = jnp.float32


# ---------------------------------------------------------------------------
# Host-side constants (numpy, memoized by shape)
# ---------------------------------------------------------------------------
@functools.lru_cache(maxsize=None)
def _bilinear_matrix(out_size, in_size):
    """1-D interpolation matrix matching F.interpolate(mode='bilinear',
    align_corners=False) along one spatial axis."""
    o = np.arange(out_size, dtype=np.float64)
    s = (o + 0.5) * (in_size / out_size) - 0.5
    s = np.maximum(s, 0.0)                                   # PyTorch clamps src idx
    i0 = np.minimum(np.floor(s).astype(np.int64), in_size - 1)
    i1 = np.minimum(i0 + 1, in_size - 1)
    w_hi = (s - i0).astype(np.float32)
    w_lo = (1.0 - w_hi).astype(np.float32)
    m = np.zeros((out_size, in_size), dtype=np.float32)
    m[np.arange(out_size), i0] += w_lo
    m[np.arange(out_size), i1] += w_hi
    return m


def _nbytes(shape, itemsize):
    return int(np.prod(shape)) * int(itemsize)


def _vmem_limit_bytes(block_bytes):
    """Per-call VMEM limit: double-buffered block bytes + slack, capped at ~3/4 of
    physical VMEM (and 96 MiB)."""
    cap_fallback = 48 * 1024 * 1024
    try:
        info = pltpu.get_tpu_info()
        cap = int(getattr(info, "vmem_capacity_bytes", 0))
        cap = (cap * 3) // 4 if cap > 0 else cap_fallback
    except Exception:
        cap = cap_fallback
    cap = min(cap, 96 * 1024 * 1024)
    need = 2 * int(block_bytes) + 8 * 1024 * 1024
    return int(min(max(need, 16 * 1024 * 1024), cap))


def _pick_h_tile(h1, w1, embed, n, acc_budget=4 * 1024 * 1024):
    """H1-row tile: multiple-of-8 divisor of H1 with a bounded f32 accumulator; keep at
    least 2 total grid steps when possible (v7x has 2 TensorCores)."""
    divs = [d for d in range(8, h1 + 1, 8) if h1 % d == 0]
    if not divs:
        return h1                                   # full-dim block is always legal
    fit = [d for d in divs if d * w1 * embed * 4 <= acc_budget]
    th = max(fit) if fit else min(divs)
    if n * (h1 // th) < 2:
        smaller = [d for d in divs if d < th]
        if smaller:
            th = max(smaller)
    return th


# ---------------------------------------------------------------------------
# Kernel 1: folded (linear_c{i} @ linear_fuse block) channel projections, per image
# ---------------------------------------------------------------------------
def _proj_kernel(c1_ref, c2_ref, c3_ref, c4_ref,
                 v1_ref, v2_ref, v3_ref, v4_ref,
                 g1_ref, g2_ref, g3_ref, g4_ref):
    g1_ref[0] = jnp.dot(c1_ref[0], v1_ref[...], preferred_element_type=F32).astype(g1_ref.dtype)
    g2_ref[0] = jnp.dot(c2_ref[0], v2_ref[...], preferred_element_type=F32).astype(g2_ref.dtype)
    g3_ref[0] = jnp.dot(c3_ref[0], v3_ref[...], preferred_element_type=F32).astype(g3_ref.dtype)
    g4_ref[0] = jnp.dot(c4_ref[0], v4_ref[...], preferred_element_type=F32).astype(g4_ref.dtype)


# ---------------------------------------------------------------------------
# Kernel 2: W-axis bilinear resize (separable stage 1) for scales 2..4, per image
# inputs are w-major wide views (W_i, H_i*embed); outputs (W1, H_i*embed)
# ---------------------------------------------------------------------------
def _wres_kernel(g2_ref, g3_ref, g4_ref, rw2_ref, rw3_ref, rw4_ref,
                 s2_ref, s3_ref, s4_ref):
    s2_ref[0] = jnp.dot(rw2_ref[...], g2_ref[0], preferred_element_type=F32).astype(s2_ref.dtype)
    s3_ref[0] = jnp.dot(rw3_ref[...], g3_ref[0], preferred_element_type=F32).astype(s3_ref.dtype)
    s4_ref[0] = jnp.dot(rw4_ref[...], g4_ref[0], preferred_element_type=F32).astype(s4_ref.dtype)


# ---------------------------------------------------------------------------
# Kernel 3: H-axis resize (separable stage 2) + fuse + folded BN + ReLU + linear_pred
# per (batch, H1-row-tile); everything stays lane-dense (TH, W1*embed)
# ---------------------------------------------------------------------------
def _fuse_kernel(g1_ref, s2_ref, s3_ref, s4_ref,
                 rh2_ref, rh3_ref, rh4_ref,
                 scale_ref, shift_ref, pmat_ref, bp_ref, pred_ref):
    acc = g1_ref[0].astype(F32)                                        # c1: no resize
    acc = acc + jnp.dot(rh2_ref[...], s2_ref[0], preferred_element_type=F32)
    acc = acc + jnp.dot(rh3_ref[...], s3_ref[0], preferred_element_type=F32)
    acc = acc + jnp.dot(rh4_ref[...], s4_ref[0], preferred_element_type=F32)
    # folded (embedding biases -> linear_fuse) + BatchNorm (inference) + ReLU
    fused = jnp.maximum(acc * scale_ref[...] + shift_ref[...], 0.0)
    # dropout(p=0.1) is identity at inference
    pred = jnp.dot(fused.astype(BF16), pmat_ref[...], preferred_element_type=F32)
    pred_ref[0] = pred + bp_ref[0]


# ---------------------------------------------------------------------------
# Kernel 4: separable 2x bilinear upsample + sigmoid on the tiny pred map, per image
# ---------------------------------------------------------------------------
def _head_kernel(pred_ref, uh_ref, uwt_ref, out_ref):
    p = pred_ref[0].astype(BF16)
    t = jnp.dot(uh_ref[...], p, preferred_element_type=F32).astype(BF16)
    up = jnp.dot(t, uwt_ref[...], preferred_element_type=F32)
    out_ref[0] = jax.nn.sigmoid(up)


# ---------------------------------------------------------------------------
# Wrapper
# ---------------------------------------------------------------------------
def colonformer_segformer_forward(feats, params):
    """feats: (c1, c2, c3, c4) NCHW backbone features with channels (128,256,512,1024).
    Returns the sigmoid probability map of shape (N, 1, 2*H1, 2*W1)."""
    c1, c2, c3, c4 = feats
    n = c1.shape[0]
    C1, C2, C3, C4 = [c.shape[1] for c in (c1, c2, c3, c4)]
    H1, W1 = c1.shape[2], c1.shape[3]
    H2, W2 = c2.shape[2], c2.shape[3]
    H3, W3 = c3.shape[2], c3.shape[3]
    H4, W4 = c4.shape[2], c4.shape[3]
    E = params["w1"].shape[1]
    P1, P2, P3, P4 = H1 * W1, H2 * W2, H3 * W3, H4 * W4

    # --- layout plumbing (pure transposes / free row-major reshapes) ---
    c1_rows = jnp.transpose(c1, (0, 2, 3, 1)).reshape(n, P1, C1).astype(BF16)   # h-major

    def to_cols(x):  # w-major pixel order: row index = w*H + h
        nn, cc, hh, ww = x.shape
        return jnp.transpose(x, (0, 3, 2, 1)).reshape(nn, ww * hh, cc).astype(BF16)

    c2_cols, c3_cols, c4_cols = to_cols(c2), to_cols(c3), to_cols(c4)

    # --- fold linear_c{i} with the matching linear_fuse block; fold biases + BN ---
    v1 = (params["w1"] @ params["wf1"]).astype(BF16)
    v2 = (params["w2"] @ params["wf2"]).astype(BF16)
    v3 = (params["w3"] @ params["wf3"]).astype(BF16)
    v4 = (params["w4"] @ params["wf4"]).astype(BF16)
    bias_fuse = (params["b1"] @ params["wf1"] + params["b2"] @ params["wf2"]
                 + params["b3"] @ params["wf3"] + params["b4"] @ params["wf4"])
    scale = params["bn_scale"].astype(F32)                              # (1, E)
    shift = (params["bn_shift"] + params["bn_scale"] * bias_fuse).astype(F32)
    scale_t = jnp.tile(scale, (1, W1))                                  # (1, W1*E)
    shift_t = jnp.tile(shift, (1, W1))

    # --- separable resize / upsample matrices (host numpy, cached by shape) ---
    rh2 = jnp.asarray(_bilinear_matrix(H1, H2), BF16)
    rh3 = jnp.asarray(_bilinear_matrix(H1, H3), BF16)
    rh4 = jnp.asarray(_bilinear_matrix(H1, H4), BF16)
    rw2 = jnp.asarray(_bilinear_matrix(W1, W2), BF16)
    rw3 = jnp.asarray(_bilinear_matrix(W1, W3), BF16)
    rw4 = jnp.asarray(_bilinear_matrix(W1, W4), BF16)
    uh = jnp.asarray(_bilinear_matrix(2 * H1, H1), BF16)                # (2H1, H1)
    uwt = jnp.asarray(_bilinear_matrix(2 * W1, W1).T, BF16)             # (W1, 2W1)

    # linear_pred as kron(I_W1, wp): exact per-pixel 128->1 projection on the wide view
    pmat = jnp.kron(jnp.eye(W1, dtype=F32), params["wp"].astype(F32)).astype(BF16)
    bp = params["bp"].reshape((1,)).astype(F32)

    par = ("parallel",)

    # --- kernel 1: channel projections (per image) ---
    vmem1 = _vmem_limit_bytes(
        _nbytes((P1, C1), 2) + _nbytes((P2, C2), 2) + _nbytes((P3, C3), 2)
        + _nbytes((P4, C4), 2) + _nbytes((C1 + C2 + C3 + C4, E), 2)
        + _nbytes((P1 + P2 + P3 + P4, E), 2))
    g1, g2, g3, g4 = pl.pallas_call(
        _proj_kernel,
        out_shape=(jax.ShapeDtypeStruct((n, P1, E), BF16),
                   jax.ShapeDtypeStruct((n, P2, E), BF16),
                   jax.ShapeDtypeStruct((n, P3, E), BF16),
                   jax.ShapeDtypeStruct((n, P4, E), BF16)),
        grid=(n,),
        in_specs=[
            pl.BlockSpec((1, P1, C1), lambda b: (b, 0, 0)),
            pl.BlockSpec((1, P2, C2), lambda b: (b, 0, 0)),
            pl.BlockSpec((1, P3, C3), lambda b: (b, 0, 0)),
            pl.BlockSpec((1, P4, C4), lambda b: (b, 0, 0)),
            pl.BlockSpec((C1, E), lambda b: (0, 0)),
            pl.BlockSpec((C2, E), lambda b: (0, 0)),
            pl.BlockSpec((C3, E), lambda b: (0, 0)),
            pl.BlockSpec((C4, E), lambda b: (0, 0)),
        ],
        out_specs=(pl.BlockSpec((1, P1, E), lambda b: (b, 0, 0)),
                   pl.BlockSpec((1, P2, E), lambda b: (b, 0, 0)),
                   pl.BlockSpec((1, P3, E), lambda b: (b, 0, 0)),
                   pl.BlockSpec((1, P4, E), lambda b: (b, 0, 0))),
        compiler_params=pltpu.CompilerParams(
            dimension_semantics=par, vmem_limit_bytes=vmem1),
    )(c1_rows, c2_cols, c3_cols, c4_cols, v1, v2, v3, v4)

    # free row-major reshapes to the "wide" views the resize matmuls need
    g1w = g1.reshape(n, H1, W1 * E)          # h-major wide (c1, no resize)
    g2w = g2.reshape(n, W2, H2 * E)          # w-major wide (scales 2..4)
    g3w = g3.reshape(n, W3, H3 * E)
    g4w = g4.reshape(n, W4, H4 * E)

    # --- kernel 2: W-axis resize for scales 2..4 (per image) ---
    vmem2 = _vmem_limit_bytes(
        _nbytes((W2, H2 * E), 2) + _nbytes((W3, H3 * E), 2) + _nbytes((W4, H4 * E), 2)
        + _nbytes((W1, (H2 + H3 + H4) * E), 2) + _nbytes((W1, W2 + W3 + W4), 2))
    s2w, s3w, s4w = pl.pallas_call(
        _wres_kernel,
        out_shape=(jax.ShapeDtypeStruct((n, W1, H2 * E), BF16),
                   jax.ShapeDtypeStruct((n, W1, H3 * E), BF16),
                   jax.ShapeDtypeStruct((n, W1, H4 * E), BF16)),
        grid=(n,),
        in_specs=[
            pl.BlockSpec((1, W2, H2 * E), lambda b: (b, 0, 0)),
            pl.BlockSpec((1, W3, H3 * E), lambda b: (b, 0, 0)),
            pl.BlockSpec((1, W4, H4 * E), lambda b: (b, 0, 0)),
            pl.BlockSpec((W1, W2), lambda b: (0, 0)),
            pl.BlockSpec((W1, W3), lambda b: (0, 0)),
            pl.BlockSpec((W1, W4), lambda b: (0, 0)),
        ],
        out_specs=(pl.BlockSpec((1, W1, H2 * E), lambda b: (b, 0, 0)),
                   pl.BlockSpec((1, W1, H3 * E), lambda b: (b, 0, 0)),
                   pl.BlockSpec((1, W1, H4 * E), lambda b: (b, 0, 0))),
        compiler_params=pltpu.CompilerParams(
            dimension_semantics=par, vmem_limit_bytes=vmem2),
    )(g2w, g3w, g4w, rw2, rw3, rw4)

    # intrinsic separable-resize layout change, done on the small per-scale maps in XLA
    def to_hmajor(s, hi):
        return jnp.transpose(s.reshape(n, W1, hi, E), (0, 2, 1, 3)).reshape(n, hi, W1 * E)

    s2h, s3h, s4h = to_hmajor(s2w, H2), to_hmajor(s3w, H3), to_hmajor(s4w, H4)

    # --- kernel 3: H-axis resize + fuse + BN + ReLU + linear_pred ---
    TH = _pick_h_tile(H1, W1, E, n)
    tgrid = H1 // TH
    vmem3 = _vmem_limit_bytes(
        _nbytes((TH, W1 * E), 2) + _nbytes((H2 + H3 + H4, W1 * E), 2)
        + _nbytes((TH, H2 + H3 + H4), 2) + _nbytes((W1 * E, W1), 2)
        + _nbytes((TH, W1 * E), 4) + 2 * _nbytes((1, W1 * E), 4) + _nbytes((TH, W1), 4))
    pred = pl.pallas_call(
        _fuse_kernel,
        out_shape=jax.ShapeDtypeStruct((n, H1, W1), F32),
        grid=(n, tgrid),
        in_specs=[
            pl.BlockSpec((1, TH, W1 * E), lambda b, t: (b, t, 0)),
            pl.BlockSpec((1, H2, W1 * E), lambda b, t: (b, 0, 0)),
            pl.BlockSpec((1, H3, W1 * E), lambda b, t: (b, 0, 0)),
            pl.BlockSpec((1, H4, W1 * E), lambda b, t: (b, 0, 0)),
            pl.BlockSpec((TH, H2), lambda b, t: (t, 0)),
            pl.BlockSpec((TH, H3), lambda b, t: (t, 0)),
            pl.BlockSpec((TH, H4), lambda b, t: (t, 0)),
            pl.BlockSpec((1, W1 * E), lambda b, t: (0, 0)),
            pl.BlockSpec((1, W1 * E), lambda b, t: (0, 0)),
            pl.BlockSpec((W1 * E, W1), lambda b, t: (0, 0)),
            pl.BlockSpec(memory_space=pltpu.MemorySpace.SMEM),
        ],
        out_specs=pl.BlockSpec((1, TH, W1), lambda b, t: (b, t, 0)),
        compiler_params=pltpu.CompilerParams(
            dimension_semantics=("parallel", "parallel"), vmem_limit_bytes=vmem3),
    )(g1w, s2h, s3h, s4h, rh2, rh3, rh4, scale_t, shift_t, pmat, bp)

    # --- kernel 4: 2x bilinear upsample + sigmoid on the tiny pred map ---
    vmem4 = _vmem_limit_bytes(
        _nbytes((H1, W1), 4) + _nbytes((2 * H1, H1), 2) + _nbytes((W1, 2 * W1), 2)
        + _nbytes((2 * H1, 2 * W1), 4))
    prob = pl.pallas_call(
        _head_kernel,
        out_shape=jax.ShapeDtypeStruct((n, 2 * H1, 2 * W1), F32),
        grid=(n,),
        in_specs=[
            pl.BlockSpec((1, H1, W1), lambda b: (b, 0, 0)),
            pl.BlockSpec((2 * H1, H1), lambda b: (0, 0)),
            pl.BlockSpec((W1, 2 * W1), lambda b: (0, 0)),
        ],
        out_specs=pl.BlockSpec((1, 2 * H1, 2 * W1), lambda b: (b, 0, 0)),
        compiler_params=pltpu.CompilerParams(
            dimension_semantics=par, vmem_limit_bytes=vmem4),
    )(pred, uh, uwt)

    # (N, 2H1, 2W1) -> NCHW (num_classes = 1)
    return prob[:, None, :, :]


# ---------------------------------------------------------------------------
# Deterministic parameter construction (synthetic, matches module shapes)
# ---------------------------------------------------------------------------
def make_params(key, dims=(128, 256, 512, 1024), embed=128, num_classes=1):
    ks = jax.random.split(key, 16)
    p = {}
    for i, cin in enumerate(dims, start=1):
        s = 1.0 / np.sqrt(cin)
        # NOTE: stored as (C_i, embed) == torch Linear weight transposed
        p[f"w{i}"] = jax.random.normal(ks[i - 1], (cin, embed), jnp.float32) * s
        p[f"b{i}"] = jax.random.normal(ks[3 + i], (1, embed), jnp.float32) * 0.01
    # linear_fuse 1x1 conv weight (4*embed -> embed), no bias (BN follows);
    # concat order in torch is [_c4, _c3, _c2, _c1]
    wf = jax.random.normal(ks[8], (4 * embed, embed), jnp.float32) / np.sqrt(4 * embed)
    p["wf4"], p["wf3"], p["wf2"], p["wf1"] = (
        wf[0 * embed:1 * embed], wf[1 * embed:2 * embed],
        wf[2 * embed:3 * embed], wf[3 * embed:4 * embed])
    # BatchNorm2d(embed), inference stats folded into scale/shift
    gamma = 1.0 + 0.1 * jax.random.normal(ks[9], (1, embed), jnp.float32)
    beta = 0.1 * jax.random.normal(ks[10], (1, embed), jnp.float32)
    rmean = 0.1 * jax.random.normal(ks[11], (1, embed), jnp.float32)
    rvar = jnp.abs(1.0 + 0.1 * jax.random.normal(ks[12], (1, embed), jnp.float32))
    eps = 1e-5
    p["bn_scale"] = gamma / jnp.sqrt(rvar + eps)
    p["bn_shift"] = beta - rmean * p["bn_scale"]
    # linear_pred: Conv2d(embed, num_classes=1, 1) with bias
    p["wp"] = jax.random.normal(ks[13], (embed, num_classes), jnp.float32) / np.sqrt(embed)
    p["bp"] = 0.01 * jax.random.normal(ks[14], (1, num_classes), jnp.float32)
    return p


if __name__ == "__main__":
    key = jax.random.PRNGKey(0)
    kp, k1, k2, k3, k4 = jax.random.split(key, 5)

    N = 2
    dims = (128, 256, 512, 1024)
    # stride-2 backbone feature pyramid (small test sizes), c1 = highest resolution
    c1 = jax.random.normal(k1, (N, dims[0], 32, 32), jnp.float32)
    c2 = jax.random.normal(k2, (N, dims[1], 16, 16), jnp.float32)
    c3 = jax.random.normal(k3, (N, dims[2], 8, 8), jnp.float32)
    c4 = jax.random.normal(k4, (N, dims[3], 4, 4), jnp.float32)

    params = make_params(kp, dims=dims, embed=128, num_classes=1)

    out = colonformer_segformer_forward((c1, c2, c3, c4), params)
    out = jax.block_until_ready(out)

    assert out.shape == (N, 1, 64, 64), out.shape
    assert bool(jnp.all(jnp.isfinite(out)))
    assert bool(jnp.all((out >= 0.0) & (out <= 1.0)))
    print("KERNEL_OK")
</pallas_src>

<mosaic_0001>
module attributes {stable_mosaic.version = 11 : i64} {
  func.func @_proj_kernel(%arg0: i32, %arg1: memref<1x1024x128xbf16, #tpu.memory_space<vmem>>, %arg2: memref<1x256x256xbf16, #tpu.memory_space<vmem>>, %arg3: memref<1x64x512xbf16, #tpu.memory_space<vmem>>, %arg4: memref<1x16x1024xbf16, #tpu.memory_space<vmem>>, %arg5: memref<128x128xbf16, #tpu.memory_space<vmem>>, %arg6: memref<256x128xbf16, #tpu.memory_space<vmem>>, %arg7: memref<512x128xbf16, #tpu.memory_space<vmem>>, %arg8: memref<1024x128xbf16, #tpu.memory_space<vmem>>, %arg9: memref<1x1024x128xbf16, #tpu.memory_space<vmem>>, %arg10: memref<1x256x128xbf16, #tpu.memory_space<vmem>>, %arg11: memref<1x64x128xbf16, #tpu.memory_space<vmem>>, %arg12: memref<1x16x128xbf16, #tpu.memory_space<vmem>>) attributes {dimension_semantics = [#tpu.dimension_semantics<parallel>], iteration_bounds = array<i64: 2>, scalar_prefetch = 0 : i64, scratch_operands = 0 : i64, tpu.core_type = #tpu.core_type<tc>, window_params = [{transform_indices = @transform_0, window_bounds = array<i64: 1, 1024, 128>}, {transform_indices = @transform_1, window_bounds = array<i64: 1, 256, 256>}, {transform_indices = @transform_2, window_bounds = array<i64: 1, 64, 512>}, {transform_indices = @transform_3, window_bounds = array<i64: 1, 16, 1024>}, {pipeline_mode = #tpu.pipeline_mode<synchronous>, transform_indices = @transform_4, window_bounds = array<i64: 128, 128>}, {pipeline_mode = #tpu.pipeline_mode<synchronous>, transform_indices = @transform_5, window_bounds = array<i64: 256, 128>}, {pipeline_mode = #tpu.pipeline_mode<synchronous>, transform_indices = @transform_6, window_bounds = array<i64: 512, 128>}, {pipeline_mode = #tpu.pipeline_mode<synchronous>, transform_indices = @transform_7, window_bounds = array<i64: 1024, 128>}, {transform_indices = @transform_8, window_bounds = array<i64: 1, 1024, 128>}, {transform_indices = @transform_9, window_bounds = array<i64: 1, 256, 128>}, {transform_indices = @transform_10, window_bounds = array<i64: 1, 64, 128>}, {transform_indices = @transform_11, window_bounds = array<i64: 1, 16, 128>}]} {
    %c0 = arith.constant 0 : index
    %c0_0 = arith.constant 0 : index
    %c0_1 = arith.constant 0 : index
    %0 = vector.load %arg1[%c0, %c0_0, %c0_1] : memref<1x1024x128xbf16, #tpu.memory_space<vmem>>, vector<1x1024x128xbf16>
    %1 = vector.shape_cast %0 : vector<1x1024x128xbf16> to vector<1024x128xbf16>
    %c0_2 = arith.constant 0 : index
    %c0_3 = arith.constant 0 : index
    %2 = vector.load %arg5[%c0_2, %c0_3] : memref<128x128xbf16, #tpu.memory_space<vmem>>, vector<128x128xbf16>
    %cst = arith.constant dense<0.000000e+00> : vector<1024x128xf32>
    %3 = tpu.matmul %1, %2, %cst {dimension_numbers = #tpu.dot_dimension_numbers<[1], [0], [0], [1], [0, 0, 1, 1], [], []>} : vector<1024x128xbf16>, vector<128x128xbf16>, vector<1024x128xf32> -> vector<1024x128xf32>
    %4 = arith.truncf %3 : vector<1024x128xf32> to vector<1024x128xbf16>
    %c0_4 = arith.constant 0 : index
    %c0_5 = arith.constant 0 : index
    %c0_6 = arith.constant 0 : index
    %5 = vector.load %arg9[%c0_4, %c0_5, %c0_6] : memref<1x1024x128xbf16, #tpu.memory_space<vmem>>, vector<1x1024x128xbf16>
    %6 = vector.shape_cast %5 : vector<1x1024x128xbf16> to vector<1024x128xbf16>
    %7 = vector.shape_cast %4 : vector<1024x128xbf16> to vector<1x1024x128xbf16>
    tpu.vector_store %arg9[%c0_4, %c0_5, %c0_6], %7 {strides = array<i32>} : memref<1x1024x128xbf16, #tpu.memory_space<vmem>>, vector<1x1024x128xbf16>,
    %c0_7 = arith.constant 0 : index
    %c0_8 = arith.constant 0 : index
    %c0_9 = arith.constant 0 : index
    %8 = vector.load %arg2[%c0_7, %c0_8, %c0_9] : memref<1x256x256xbf16, #tpu.memory_space<vmem>>, vector<1x256x256xbf16>
    %9 = vector.shape_cast %8 : vector<1x256x256xbf16> to vector<256x256xbf16>
    %c0_10 = arith.constant 0 : index
    %c0_11 = arith.constant 0 : index
    %10 = vector.load %arg6[%c0_10, %c0_11] : memref<256x128xbf16, #tpu.memory_space<vmem>>, vector<256x128xbf16>
    %cst_12 = arith.constant dense<0.000000e+00> : vector<256x128xf32>
    %11 = tpu.matmul %9, %10, %cst_12 {dimension_numbers = #tpu.dot_dimension_numbers<[1], [0], [0], [1], [0, 0, 1, 1], [], []>} : vector<256x256xbf16>, vector<256x128xbf16>, vector<256x128xf32> -> vector<256x128xf32>
    %12 = arith.truncf %11 : vector<256x128xf32> to vector<256x128xbf16>
    %c0_13 = arith.constant 0 : index
    %c0_14 = arith.constant 0 : index
    %c0_15 = arith.constant 0 : index
    %13 = vector.load %arg10[%c0_13, %c0_14, %c0_15] : memref<1x256x128xbf16, #tpu.memory_space<vmem>>, vector<1x256x128xbf16>
    %14 = vector.shape_cast %13 : vector<1x256x128xbf16> to vector<256x128xbf16>
    %15 = vector.shape_cast %12 : vector<256x128xbf16> to vector<1x256x128xbf16>
    tpu.vector_store %arg10[%c0_13, %c0_14, %c0_15], %15 {strides = array<i32>} : memref<1x256x128xbf16, #tpu.memory_space<vmem>>, vector<1x256x128xbf16>,
    %c0_16 = arith.constant 0 : index
    %c0_17 = arith.constant 0 : index
    %c0_18 = arith.constant 0 : index
    %16 = vector.load %arg3[%c0_16, %c0_17, %c0_18] : memref<1x64x512xbf16, #tpu.memory_space<vmem>>, vector<1x64x512xbf16>
    %17 = vector.shape_cast %16 : vector<1x64x512xbf16> to vector<64x512xbf16>
    %c0_19 = arith.constant 0 : index
    %c0_20 = arith.constant 0 : index
    %18 = vector.load %arg7[%c0_19, %c0_20] : memref<512x128xbf16, #tpu.memory_space<vmem>>, vector<512x128xbf16>
    %cst_21 = arith.constant dense<0.000000e+00> : vector<64x128xf32>
    %19 = tpu.matmul %17, %18, %cst_21 {dimension_numbers = #tpu.dot_dimension_numbers<[1], [0], [0], [1], [0, 0, 1, 1], [], []>} : vector<64x512xbf16>, vector<512x128xbf16>, vector<64x128xf32> -> vector<64x128xf32>
    %20 = arith.truncf %19 : vector<64x128xf32> to vector<64x128xbf16>
    %c0_22 = arith.constant 0 : index
    %c0_23 = arith.constant 0 : index
    %c0_24 = arith.constant 0 : index
    %21 = vector.load %arg11[%c0_22, %c0_23, %c0_24] : memref<1x64x128xbf16, #tpu.memory_space<vmem>>, vector<1x64x128xbf16>
    %22 = vector.shape_cast %21 : vector<1x64x128xbf16> to vector<64x128xbf16>
    %23 = vector.shape_cast %20 : vector<64x128xbf16> to vector<1x64x128xbf16>
    tpu.vector_store %arg11[%c0_22, %c0_23, %c0_24], %23 {strides = array<i32>} : memref<1x64x128xbf16, #tpu.memory_space<vmem>>, vector<1x64x128xbf16>,
    %c0_25 = arith.constant 0 : index
    %c0_26 = arith.constant 0 : index
    %c0_27 = arith.constant 0 : index
    %24 = vector.load %arg4[%c0_25, %c0_26, %c0_27] : memref<1x16x1024xbf16, #tpu.memory_space<vmem>>, vector<1x16x1024xbf16>
    %25 = vector.shape_cast %24 : vector<1x16x1024xbf16> to vector<16x1024xbf16>
    %c0_28 = arith.constant 0 : index
    %c0_29 = arith.constant 0 : index
    %26 = vector.load %arg8[%c0_28, %c0_29] : memref<1024x128xbf16, #tpu.memory_space<vmem>>, vector<1024x128xbf16>
    %cst_30 = arith.constant dense<0.000000e+00> : vector<16x128xf32>
    %27 = tpu.matmul %25, %26, %cst_30 {dimension_numbers = #tpu.dot_dimension_numbers<[1], [0], [0], [1], [0, 0, 1, 1], [], []>} : vector<16x1024xbf16>, vector<1024x128xbf16>, vector<16x128xf32> -> vector<16x128xf32>
    %28 = arith.truncf %27 : vector<16x128xf32> to vector<16x128xbf16>
    %c0_31 = arith.constant 0 : index
    %c0_32 = arith.constant 0 : index
    %c0_33 = arith.constant 0 : index
    %29 = vector.load %arg12[%c0_31, %c0_32, %c0_33] : memref<1x16x128xbf16, #tpu.memory_space<vmem>>, vector<1x16x128xbf16>
    %30 = vector.shape_cast %29 : vector<1x16x128xbf16> to vector<16x128xbf16>
    %31 = vector.shape_cast %28 : vector<16x128xbf16> to vector<1x16x128xbf16>
    tpu.vector_store %arg12[%c0_31, %c0_32, %c0_33], %31 {strides = array<i32>} : memref<1x16x128xbf16, #tpu.memory_space<vmem>>, vector<1x16x128xbf16>,
    return
  }
  func.func @transform_0(%arg0: i32) -> (i32, i32, i32) {
    %c0_i32 = arith.constant 0 : i32
    %c0_i32_0 = arith.constant 0 : i32
    %c0_i32_1 = arith.constant 0 : i32
    return %arg0, %c0_i32, %c0_i32_0 : i32, i32, i32
  }
  func.func @transform_1(%arg0: i32) -> (i32, i32, i32) {
    %c0_i32 = arith.constant 0 : i32
    %c0_i32_0 = arith.constant 0 : i32
    %c0_i32_1 = arith.constant 0 : i32
    return %arg0, %c0_i32, %c0_i32_0 : i32, i32, i32
  }
  func.func @transform_2(%arg0: i32) -> (i32, i32, i32) {
    %c0_i32 = arith.constant 0 : i32
    %c0_i32_0 = arith.constant 0 : i32
    %c0_i32_1 = arith.constant 0 : i32
    return %arg0, %c0_i32, %c0_i32_0 : i32, i32, i32
  }
  func.func @transform_3(%arg0: i32) -> (i32, i32, i32) {
    %c0_i32 = arith.constant 0 : i32
    %c0_i32_0 = arith.constant 0 : i32
    %c0_i32_1 = arith.constant 0 : i32
    return %arg0, %c0_i32, %c0_i32_0 : i32, i32, i32
  }
  func.func @transform_4(%arg0: i32) -> (i32, i32) {
    %c0_i32 = arith.constant 0 : i32
    %c0_i32_0 = arith.constant 0 : i32
    %c0_i32_1 = arith.constant 0 : i32
    return %c0_i32, %c0_i32_0 : i32, i32
  }
  func.func @transform_5(%arg0: i32) -> (i32, i32) {
    %c0_i32 = arith.constant 0 : i32
    %c0_i32_0 = arith.constant 0 : i32
    %c0_i32_1 = arith.constant 0 : i32
    return %c0_i32, %c0_i32_0 : i32, i32
  }
  func.func @transform_6(%arg0: i32) -> (i32, i32) {
    %c0_i32 = arith.constant 0 : i32
    %c0_i32_0 = arith.constant 0 : i32
    %c0_i32_1 = arith.constant 0 : i32
    return %c0_i32, %c0_i32_0 : i32, i32
  }
  func.func @transform_7(%arg0: i32) -> (i32, i32) {
    %c0_i32 = arith.constant 0 : i32
    %c0_i32_0 = arith.constant 0 : i32
    %c0_i32_1 = arith.constant 0 : i32
    return %c0_i32, %c0_i32_0 : i32, i32
  }
  func.func @transform_8(%arg0: i32) -> (i32, i32, i32) {
    %c0_i32 = arith.constant 0 : i32
    %c0_i32_0 = arith.constant 0 : i32
    %c0_i32_1 = arith.constant 0 : i32
    return %arg0, %c0_i32, %c0_i32_0 : i32, i32, i32
  }
  func.func @transform_9(%arg0: i32) -> (i32, i32, i32) {
    %c0_i32 = arith.constant 0 : i32
    %c0_i32_0 = arith.constant 0 : i32
    %c0_i32_1 = arith.constant 0 : i32
    return %arg0, %c0_i32, %c0_i32_0 : i32, i32, i32
  }
  func.func @transform_10(%arg0: i32) -> (i32, i32, i32) {
    %c0_i32 = arith.constant 0 : i32
    %c0_i32_0 = arith.constant 0 : i32
    %c0_i32_1 = arith.constant 0 : i32
    return %arg0, %c0_i32, %c0_i32_0 : i32, i32, i32
  }
  func.func @transform_11(%arg0: i32) -> (i32, i32, i32) {
    %c0_i32 = arith.constant 0 : i32
    %c0_i32_0 = arith.constant 0 : i32
    %c0_i32_1 = arith.constant 0 : i32
    return %arg0, %c0_i32, %c0_i32_0 : i32, i32, i32
  }
}

</mosaic_0001>

<bundles_post_ra>
// kernel: tpu_custom_call.1
= control target key start
LH: loop header
LB: loop body
LE: loop exit
PB: predicated region body
PF: predicated region fallthrough
CT: control target
= control target key end

     0   :  { %s6955_s0 = inlined_call_operand.hbm [shape: bf16[2,1024,128], index: 0, kind: input, shape index: {}]   ;;  %s6956_s1 = inlined_call_operand.hbm [shape: bf16[2,256,256], index: 1, kind: input, shape index: {}]   ;;  %s6957_s2 = inlined_call_operand.hbm [shape: bf16[2,64,512], index: 2, kind: input, shape index: {}]   ;;  %s6958_s3 = inlined_call_operand.hbm [shape: bf16[2,16,1024], index: 3, kind: input, shape index: {}]   ;;  %s6959_s4 = inlined_call_operand.hbm [shape: bf16[128,128], index: 4, kind: input, shape index: {}]   ;;  %s6960_s5 = inlined_call_operand.hbm [shape: bf16[256,128], index: 5, kind: input, shape index: {}]   ;;  %s6961_s6 = inlined_call_operand.hbm [shape: bf16[512,128], index: 6, kind: input, shape index: {}]   ;;  %s6962_s7 = inlined_call_operand.hbm [shape: bf16[1024,128], index: 7, kind: input, shape index: {}]   ;;  %s6963_s8 = inlined_call_operand.hbm [shape: bf16[2,1024,128], index: 8, kind: output, shape index: {0}]   ;;  %s6964_s9 = inlined_call_operand.hbm [shape: bf16[2,256,128], index: 9, kind: output, shape index: {1}]   ;;  %s6965_s10 = inlined_call_operand.hbm [shape: bf16[2,64,128], index: 10, kind: output, shape index: {2}]   ;;  %s6966_s11 = inlined_call_operand.hbm [shape: bf16[2,16,128], index: 11, kind: output, shape index: {3}]  }
   0x1   :  { %6981 = sst [smem:[#allocation36_spill]] %s6956_s1 }
   0x2   :  { %6982 = sst [smem:[#allocation37_spill]] %s6959_s4 }
   0x3   :  { %6983 = sst [smem:[#allocation38_spill]] %s6960_s5 }
   0x4   :  { %6984 = sst [smem:[#allocation39_spill]] %s6961_s6 }
   0x5   :  { %6985 = sst [smem:[#allocation40_spill]] %s6962_s7 }
   0x6   :  { %6986 = sst [smem:[#allocation41_spill]] %s6963_s8 }
   0x7   :  { %6987 = sst [smem:[#allocation42_spill]] %s6966_s11 }
   0x8   :  { %17 = vsyncpa [#allocation3], 0 }
   0x9   :  { %19 = vsyncpa [#allocation3 + $0x1], 0 }
   0xa   :  { %20 = vsyncpa [#allocation6], 0 }
   0xb   :  { %22 = vsyncpa [#allocation6 + $0x1], 0 }
   0xc   :  { %23 = vsyncpa [#allocation9], 0 }
   0xd   :  { %25 = vsyncpa [#allocation9 + $0x1], 0 }
   0xe   :  { %26 = vsyncpa [#allocation12], 0 }
   0xf   :  { %27 = vsyncpa [#allocation15], 0 }
  0x10   :  { %28 = vsyncpa [#allocation4], 0 }
  0x11   :  { %30 = vsyncpa [#allocation4 + $0x1], 0 }
  0x12   :  { %31 = vsyncpa [#allocation18], 0 }
  0x13   :  { %33 = vsyncpa [#allocation18 + $0x1], 0 }
  0x14   :  { %34 = vsyncpa [#allocation21], 0 }
  0x15   :  { %36 = vsyncpa [#allocation21 + $0x1], 0  ;;  %s6267_s17 = smov 0   ;;  %s6269_s18 = smov 0  }
  0x16   :  { %s6271_s19 = smov 0   ;;  %s6273_s20 = smov 0  }
  0x17 LB: > { %6988 = sst [smem:[#allocation31_spill]] %s6179_s17  ;;  %s6288_s21 = sadd.s32 4294967295, %s6191_s20   ;;  %s6191_s20 = sphi %s6273_s20, %s7019_s20   ;;  %s6187_s19 = sphi %s6271_s19, %s7021_s19   ;;  %s6183_s18 = sphi %s6269_s18, %s7023_s18   ;;  %s6179_s17 = sphi %s6267_s17, %s7022_s17  }
  0x18   : > { %6989 = sst [smem:[#allocation32_spill]] %s6187_s19  ;;  %s6967_s22 = sadd.s32 4294967294, %s6191_s20  }
  0x19   : > { %p62_p0 = scmp.ne.s32.totalorder %s6183_s18, %s6179_s17  ;;  %p6977_p1 = scmp.eq.s32.totalorder %s6288_s21, 0 }
  0x1a   : > { %p248_p2 = scmp.eq.s32.totalorder %s6288_s21, 1  ;;  %p254_p3 = scmp.eq.s32.totalorder %s6967_s22, 1 }
  0x1b   : > { %p6299_p4 = por %p6977_p1, %p62_p0  ;;  %p3863_p5 = scmp.ge.s32.totalorder %s6191_s20, 1 }
  0x1c   : > { %p6304_p6 = por %p254_p3, %p62_p0  ;;  %p339_p7 = scmp.lt.s32.totalorder %s6191_s20, 3 }
  0x1d   : > { %s6993_s4 = sld [smem:[#allocation37_spill]]  ;;  %s6193_s29 = smov [#allocation10]  }
  0x1e   : > { %s6991_s24 = scalar_select %p6304_p6, 1, 0 }
  0x1f   : > { %p6312_p8 = pnand %p3863_p5, %p339_p7  ;;  %s352_s30 = sshll.u32 %s6193_s29, 4  ;;  %s353_s30 = int_to_ptr.vmem [resolvable:$true] %s352_s30 }
  0x20   : > { %6992 = sst [smem:[#allocation33_spill]] %s6991_s24  ;;  %s6968_s16 = smov 64  }
  0x21   : > { %p5678_p9 = pneg %p6312_p8  ;;  %s6996_s5 = sld [smem:[#allocation38_spill]] }
  0x22   : > { %s6970_s25 = smov 4   ;;  %s6196_s26 = smov [#allocation11]  }
  0x23   : > { %s350_s27 = sshll.u32 %s6993_s4, 4  ;;  %p6320_p10 = pnand %p5678_p9, %p6977_p1  ;;  %s351_s27 = int_to_ptr.hbm [resolvable:$true] %s350_s27 }
  0x24   : > { %s366_s29 = sshll.u32 %s6196_s26, 4  ;;  %s6339_s13 = sadd.s32 1, %s6191_s20   ;;  %s367_s29 = int_to_ptr.vmem [resolvable:$true] %s366_s29 }
  0x25   : > { %5681 = dma.hbm_to_vmem [thread:$0]  (!%p6320_p10), %s351_s27, 1024, %s353_s30, [#allocation9], %s6968_s16, %s6968_s16, %s6970_s25  }
  0x26   : > { %6997 = sst [smem:[#allocation34_spill]] %s6339_s13  ;;  %s49_s14 = sadd.s32 1, %s6187_s19 }
  0x27   : > { %s364_s15 = sshll.u32 %s6996_s5, 4  ;;  %s46_s22 = ssub.s32 %s6191_s20, %s6339_s13  ;;  %s365_s15 = int_to_ptr.hbm [resolvable:$true] %s364_s15 }
  0x28   : > { %5684 = dma.hbm_to_vmem [thread:$0]  (!%p6320_p10), %s365_s15, 2048, %s367_s29, [#allocation12], %s6968_s16, %s6968_s16, %s6970_s25  }
  0x29   : > { %p56_p12 = scmp.ne.s32.totalorder %s6187_s19, %s6183_s18  ;;  %p47_p13 = scmp.eq.s32.totalorder %s46_s22, 0 }
  0x2a   : > { %p57_p0 = scmp.eq.s32.totalorder %s6191_s20, 0  ;;  %p5721_p5 = scmp.lt.s32.totalorder %s6191_s20, 2 }
  0x2b   : > { %p6349_p3 = por %p248_p2, %p56_p12  ;;  %s6358_s26 = sand.u32 1, %s6187_s19  }
  0x2c   : > { %s6355_s30 = scalar_select %p47_p13, %s6187_s19, %s49_s14  }
  0x2d   : > { %p58_p7 = por %p57_p0, %p56_p12  ;;  %s6978_s15 = sand.u32 1, %s6191_s20  }
  0x2e   : > { %6999 = sst [smem:[#allocation35_spill]] %s6355_s30  ;;  %s3872_s29 = sshll.u32 %s6358_s26, 8 }
  0x2f   : > { %p6362_p9 = pnand %p5721_p5, %p58_p7  ;;  %s4869_s22 = sshll.u32 %s6191_s20, 8 }
  0x30   : > { %s7001_s1 = sld [smem:[#allocation36_spill]]  ;;  %s434_s14 = scalar_lea.vmem [#allocation5], %s3872_s29 }
  0x31   : > { %s442_s30 = sshll.u32 %s434_s14, 4  ;;  %s6372_s19 = scalar_lea.sflag [#allocation6], %s6978_s15  ;;  %s443_s30 = int_to_ptr.vmem [resolvable:$true] %s442_s30 }
  0x32   : > { %p5837_p12 = pneg %p6362_p9 }
  0x36   : > { %s439_s5 = scalar_lea.hbm %s7001_s1, %s4869_s22 }
  0x37   : > { %s440_s13 = sshll.u32 %s439_s5, 4  ;;  %s5840_s5 = scalar_lea.hbm %s7001_s1, 512  ;;  %s441_s13 = int_to_ptr.hbm [resolvable:$true] %s440_s13 }
  0x38   : > { %s5833_s24 = sshra.s32 %s441_s13, 4  ;;  %s5834_s24 = int_to_ptr.hbm [resolvable:$true] %s5833_s24 }
  0x39   : > { %s5835_s17 = scalar_lea.hbm %s5834_s24, 256  ;;  %p5841_p5 = scmp.lt.s32.totalorder %s5834_s24, %s7001_s1 }
  0x3a   : > { %p5836_p2 = scmp.ne.s32.totalorder %s5834_s24, %s5835_s17  ;;  %p5842_p7 = scmp.lt.s32.totalorder %s5840_s5, %s5835_s17 }
  0x3c   : > { %p5838_p13 = pnand %p5837_p12, %p5836_p2  ;;  %p5843_p11 = por %p5842_p7, %p5841_p5 }
  0x3e   : > { %p5839_p0 = pneg %p5838_p13 }
  0x40   : > { %p5844_p1 = pnand %p5843_p11, %p5839_p0 }
  0x42   : > { %5847 = shalt.err (!%p5844_p1)
}
  0x43   : > { %s6197_s14 = smov 128   ;;  %s6198_s15 = smov 8  }
  0x44   : > { %5697 = dma.hbm_to_vmem [thread:$0]  (!%p6362_p9), %s441_s13, 4096, %s443_s30, %s6372_s19, %s6197_s14, %s6197_s14, %s6198_s15  }
  0x45   : > { %s7002_s6 = sld [smem:[#allocation39_spill]]  ;;  %s6199_s24 = smov [#allocation13]  }
  0x46   : > { %s380_s17 = sshll.u32 %s6199_s24, 4  ;;  %s7003_s7 = sld [smem:[#allocation40_spill]]  ;;  %s381_s17 = int_to_ptr.vmem [resolvable:$true] %s380_s17 }
  0x47   : > { %s7004_s1 = smov 4   ;;  %s7005_s11 = smov 64  }
  0x48   : > { %s6200_s13 = smov [#allocation14]   ;;  %s3869_s15 = sshll.u32 %s6358_s26, 9 }
  0x49   : > { %s394_s30 = sshll.u32 %s6200_s13, 4  ;;  %s4868_s14 = sshll.u32 %s6191_s20, 9  ;;  %s395_s30 = int_to_ptr.vmem [resolvable:$true] %s394_s30 }
  0x4a   : > { %s412_s4 = scalar_lea.vmem [#allocation2], %s3869_s15  ;;  %s417_s29 = scalar_lea.hbm %s6955_s0, %s4868_s14 }
  0x4b   : > { %s378_s8 = sshll.u32 %s7002_s6, 4  ;;  %s420_s25 = sshll.u32 %s412_s4, 4  ;;  %s379_s8 = int_to_ptr.hbm [resolvable:$true] %s378_s8  ;;  %s421_s25 = int_to_ptr.vmem [resolvable:$true] %s420_s25 }
  0x4c   : > { %s392_s22 = sshll.u32 %s7003_s7, 4  ;;  %s418_s6 = sshll.u32 %s417_s29, 4  ;;  %s393_s22 = int_to_ptr.hbm [resolvable:$true] %s392_s22  ;;  %s419_s6 = int_to_ptr.hbm [resolvable:$true] %s418_s6 }
  0x4d   : > { %5687 = dma.hbm_to_vmem [thread:$0]  (!%p6320_p10), %s379_s8, 4096, %s381_s17, [#allocation12], %s7005_s11, %s7005_s11, %s7004_s1  }
  0x4e   : > { %5690 = dma.hbm_to_vmem [thread:$0]  (!%p6320_p10), %s393_s22, 8192, %s395_s30, [#allocation15], %s7005_s11, %s7005_s11, %s7004_s1  }
  0x4f   : > { %s3875_s8 = sshll.u32 %s6358_s26, 7  ;;  %s409_s17 = scalar_lea.sflag [#allocation3], %s6358_s26 }
  0x50   : > { %s5923_s13 = sshra.s32 %s419_s6, 4  ;;  %s5930_s30 = scalar_lea.hbm %s6955_s0, 1024  ;;  %s5924_s13 = int_to_ptr.hbm [resolvable:$true] %s5923_s13 }
  0x51   : > { %s5925_s7 = scalar_lea.hbm %s5924_s13, 512  ;;  %p5931_p2 = scmp.lt.s32.totalorder %s5924_s13, %s6955_s0 }
  0x52   : > { %p5926_p1 = scmp.ne.s32.totalorder %s5924_s13, %s5925_s7  ;;  %p5932_p13 = scmp.lt.s32.totalorder %s5930_s30, %s5925_s7 }
  0x54   : > { %p5928_p11 = pnand %p5926_p1, %p5837_p12  ;;  %p5933_p0 = por %p5932_p13, %p5931_p2 }
  0x56   : > { %p5929_p10 = pneg %p5928_p11 }
  0x58   : > { %p5934_p5 = pnand %p5933_p0, %p5929_p10 }
  0x5a   : > { %5937 = shalt.err (!%p5934_p5)
}
  0x5b   : > { %5694 = dma.hbm_to_vmem [thread:$0]  (!%p6362_p9), %s419_s6, 8192, %s421_s25, %s409_s17, %s7005_s11, %s7005_s11, %s7004_s1  }
  0x5c   : > { %s4870_s14 = sshll.u32 %s6191_s20, 7  ;;  %s456_s24 = scalar_lea.vmem [#allocation7], %s3875_s8 }
  0x5d   : > { %s464_s5 = sshll.u32 %s456_s24, 4  ;;  %s461_s22 = scalar_lea.hbm %s6957_s2, %s4870_s14  ;;  %s465_s5 = int_to_ptr.vmem [resolvable:$true] %s464_s5 }
  0x5e   : > { %s462_s7 = sshll.u32 %s461_s22, 4  ;;  %s5960_s6 = scalar_lea.hbm %s6957_s2, 256  ;;  %s463_s7 = int_to_ptr.hbm [resolvable:$true] %s462_s7 }
  0x5f   : > { %s5953_s13 = sshra.s32 %s463_s7, 4  ;;  %s5954_s13 = int_to_ptr.hbm [resolvable:$true] %s5953_s13 }
  0x60   : > { %s5955_s30 = scalar_lea.hbm %s5954_s13, 128  ;;  %p5961_p10 = scmp.lt.s32.totalorder %s5954_s13, %s6957_s2 }
  0x61   : > { %p5956_p7 = scmp.ne.s32.totalorder %s5954_s13, %s5955_s30  ;;  %p5962_p2 = scmp.lt.s32.totalorder %s5960_s6, %s5955_s30 }
  0x63   : > { %p5958_p1 = pnand %p5956_p7, %p5837_p12  ;;  %p5963_p13 = por %p5962_p2, %p5961_p10 }
  0x65   : > { %p5959_p11 = pneg %p5958_p1 }
  0x67   : > { %p5964_p0 = pnand %p5963_p13, %p5959_p11 }
  0x69   : > { %5967 = shalt.err (!%p5964_p0)
}
  0x6a   : > { %s6201_s8 = smov 256   ;;  %s6202_s17 = smov 16  }
  0x6b   : > { %5700 = dma.hbm_to_vmem [thread:$0]  (!%p6362_p9), %s463_s7, 2048, %s465_s5, %s6372_s19, %s6201_s8, %s6201_s8, %s6202_s17  }
  0x6c   : > { %s3878_s4 = sshll.u32 %s6358_s26, 6  ;;  %s4871_s14 = sshll.u32 %s6191_s20, 6 }
  0x6d   : > { %s483_s12 = scalar_lea.hbm %s6958_s3, %s4871_s14  ;;  %s478_s13 = scalar_lea.vmem [#allocation8], %s3878_s4 }
  0x6e   : > { %s484_s22 = sshll.u32 %s483_s12, 4  ;;  %s486_s30 = sshll.u32 %s478_s13, 4  ;;  %s485_s22 = int_to_ptr.hbm [resolvable:$true] %s484_s22  ;;  %s487_s30 = int_to_ptr.vmem [resolvable:$true] %s486_s30 }
  0x6f   : > { %s7006_s15 = sand.u32 1, %s6191_s20   ;;  %s5983_s6 = sshra.s32 %s485_s22, 4  ;;  %s5984_s6 = int_to_ptr.hbm [resolvable:$true] %s5983_s6 }
  0x70   : > { %s475_s1 = scalar_lea.sflag [#allocation9], %s7006_s15  ;;  %s5985_s11 = scalar_lea.hbm %s5984_s6, 64 }
  0x71   : > { %p5986_p5 = scmp.ne.s32.totalorder %s5984_s6, %s5985_s11  ;;  %s5990_s5 = scalar_lea.hbm %s6958_s3, 128 }
  0x72   : > { %p5991_p11 = scmp.lt.s32.totalorder %s5984_s6, %s6958_s3  ;;  %p5992_p10 = scmp.lt.s32.totalorder %s5990_s5, %s5985_s11 }
  0x73   : > { %p5988_p7 = pnand %p5986_p5, %p5837_p12 }
  0x74   : > { %p5993_p2 = por %p5992_p10, %p5991_p11 }
  0x75   : > { %p5989_p1 = pneg %p5988_p7 }
  0x77   : > { %p5994_p13 = pnand %p5993_p2, %p5989_p1 }
  0x79   : > { %5997 = shalt.err (!%p5994_p13)
}
  0x7a   : > { %s6203_s8 = smov 512   ;;  %s6204_s17 = smov 32  }
  0x7b   : > { %5703 = dma.hbm_to_vmem [thread:$0]  (!%p6362_p9), %s485_s22, 1024, %s487_s30, %s475_s1, %s6203_s8, %s6203_s8, %s6204_s17  }
  0x7c   : > { %498 = sbr.rel (%p6312_p8) target bundleno = 824 (0x338), region = 52  ;;  %s6462_s4 = sand.u32 (!%p6312_p8), 1, %s6183_s18  }
  0x7d   : > { %s3882_s14 = sshll.u32 (!%p6312_p8), %s6462_s4, 9  ;;  %s501_s24 = scalar_lea.sflag (!%p6312_p8), [#allocation3], %s6462_s4 }
  0x7e   : > { %s6468_s29 = scalar_lea.vmem (!%p6312_p8), [#allocation2], %s3882_s14 }
  0x81   : > { %6142 = dma.done.wait (%p6299_p4), %s501_s24, 8192  }
  0x82   : > { %6144 = vsyncadd (%p6299_p4), %s501_s24, 4294959104  ;;  %s6475_s28 = sand.u32 1, %s6288_s21   ;;  %s3883_s16 = sshll.u32 %s6462_s4, 8 }
  0x83   : > { %s511_s12 = scalar_lea.sflag [#allocation6], %s6475_s28  ;;  %s6479_s22 = scalar_lea.vmem [#allocation5], %s3883_s16 }
  0x84   : > { %6146 = dma.done.wait (%p6299_p4), %s511_s12, 6144  }
  0x85   : > { %6148 = vsyncadd (%p6299_p4), %s511_s12, 4294961152  ;;  %s3884_s13 = sshll.u32 %s6462_s4, 7  ;;  %s3885_s30 = sshll.u32 %s6462_s4, 6 }
  0x86   : > { %s6489_s15 = scalar_lea.vmem [#allocation7], %s3884_s13  ;;  %s531_s1 = scalar_lea.sflag [#allocation9], %s6475_s28 }
  0x87   : > { %s6492_s6 = scalar_lea.vmem [#allocation8], %s3885_s30 }
  0x88   : > { %6150 = dma.done.wait (%p6299_p4), %s531_s1, 1024  }
  0x89   : > { %6152 = vsyncadd (%p6299_p4), %s531_s1, 4294966272  ;;  %p7007_p8 = scmp.eq.s32.totalorder %s6288_s21, 0 }
  0x8b   : > { %6154 = dma.done.wait (%p7007_p8), [#allocation9], 1024   ;;  %p7008_p9 = pmov %p7007_p8 }
  0x8c   : > { %p7009_p12 = pmov %p7007_p8 }
  0x8d   : > { %6156 = vsyncadd (%p7008_p9), [#allocation9], 4294966272 }
  0x8e   : > { %6158 = dma.done.wait (%p7009_p12), [#allocation12], 6144   ;;  %p7010_p0 = pmov %p7007_p8 }
  0x90   : > { %6160 = vsyncadd (%p7010_p0), [#allocation12], 4294961152  ;;  %p7011_p5 = pmov %p7010_p0 }
  0x91   : > { %p7012_p7 = pmov %p7010_p0 }
  0x92   : > { %6162 = dma.done.wait (%p7011_p5), [#allocation15], 8192  }
  0x93   : > { %6164 = vsyncadd (%p7012_p7), [#allocation15], 4294959104  ;;  %v4943_v0 = vld [vmem:[#allocation10 + $0x38] sm:$0xff]  ;;  %v4942_v1 = vld [vmem:[#allocation10 + $0x30] sm:$0xff]  ;;  %s6546_s23 = scalar_lea.vmem [#allocation16], %s3882_s14  ;;  %s6666_s11 = scalar_lea.vmem [#allocation17], %s3884_s13 }
  0x94   : > { %1200 = vmatpush.bf16.msra.mxu0 %v4943_v0  ;;  %5624 = vmatpush.bf16.msra.mxu3 %v4943_v0  ;;  %v4941_v2 = vld [vmem:[#allocation10 + $0x28] sm:$0xff]  ;;  %v4940_v3 = vld [vmem:[#allocation10 + $0x20] sm:$0xff]  ;;  %v4939_v4 = vld [vmem:[#allocation10 + $0x18] sm:$0xff]  ;;  %s3892_s19 = sshll.u32 %s6462_s4, 5  ;;  %s5113_s5 = sshll.u32 %s6288_s21, 7 }
  0x95   : > { %5622 = vmatpush.bf16.msra.mxu1 %v4943_v0  ;;  %5623 = vmatpush.bf16.msra.mxu2 %v4943_v0  ;;  %v4938_v5 = vld [vmem:[#allocation10 + $0x10] sm:$0xff]  ;;  %v4937_v6 = vld [vmem:[#allocation10 + $0x8] sm:$0xff]  ;;  %v4936_v7 = vld [vmem:[#allocation10] sm:$0xff]  ;;  %s6834_s26 = scalar_lea.vmem [#allocation19], %s3892_s19  ;;  %s3551_s8 = scalar_lea.hbm %s6964_s9, %s5113_s5 }
  0x96   : > { %v5015_v8 = vld [vmem:[#allocation13 + $0x38] sm:$0xff]  ;;  %v4872_v10 = vld [vmem:[%s6468_s29] sm:$0xff]  ;;  %v5014_v13 = vld [vmem:[#allocation13 + $0x30] sm:$0xff]  ;;  %s3552_s17 = sshll.u32 %s6666_s11, 4  ;;  %s3554_s14 = sshll.u32 %s3551_s8, 4  ;;  %s3553_s17 = int_to_ptr.vmem [resolvable:$true] %s3552_s17  ;;  %s3555_s14 = int_to_ptr.hbm [resolvable:$true] %s3554_s14 }
  0x97   : > { %v4983_v9 = vld [vmem:[#allocation11 + $0x38] sm:$0xff]  ;;  %v4904_v12 = vld [vmem:[%s6468_s29 + $0x100] sm:$0xff]  ;;  %v4873_v14 = vld [vmem:[%s6468_s29 + $0x8] sm:$0xff]  ;;  %s3513_s24 = scalar_lea.sflag [#allocation18], %s6475_s28  ;;  %s6033_s13 = scalar_lea.hbm %s6964_s9, 256 }
  0x98   : > { %1201 = vmatpush.bf16.msra.mxu0 %v4942_v1  ;;  %5627 = vmatpush.bf16.msra.mxu3 %v4942_v1  ;;  %v4923_v11 = vld [vmem:[%s6468_s29 + $0x198] sm:$0xff]  ;;  %v4924_v15 = vld [vmem:[%s6468_s29 + $0x1a0] sm:$0xff]  ;;  %v4905_v16 = vld [vmem:[%s6468_s29 + $0x108] sm:$0xff] }
  0x99   : > { %5625 = vmatpush.bf16.msra.mxu1 %v4942_v1  ;;  %5626 = vmatpush.bf16.msra.mxu2 %v4942_v1  ;;  %v4982_v17 = vld [vmem:[#allocation11 + $0x30] sm:$0xff]  ;;  %v5013_v18 = vld [vmem:[#allocation13 + $0x28] sm:$0xff]  ;;  %v4915_v19 = vld [vmem:[%s6468_s29 + $0x158] sm:$0xff] }
  0x9a   : > { %v4874_v20 = vld [vmem:[%s6468_s29 + $0x10] sm:$0xff]  ;;  %v4925_v21 = vld [vmem:[%s6468_s29 + $0x1a8] sm:$0xff]  ;;  %v4991_v24 = vld [vmem:[#allocation11 + $0x78] sm:$0xff] }
  0x9b   : > { %v4906_v22 = vld [vmem:[%s6468_s29 + $0x110] sm:$0xff]  ;;  %v4981_v23 = vld [vmem:[#allocation11 + $0x28] sm:$0xff]  ;;  %v4916_v25 = vld [vmem:[%s6468_s29 + $0x160] sm:$0xff] }
  0x9c   : > { %1202 = vmatpush.bf16.msra.mxu0 %v4941_v2  ;;  %5630 = vmatpush.bf16.msra.mxu3 %v4941_v2  ;;  %v4875_v26 = vld [vmem:[%s6468_s29 + $0x18] sm:$0xff]  ;;  %v4926_v27 = vld [vmem:[%s6468_s29 + $0x1b0] sm:$0xff]  ;;  %v5012_v29 = vld [vmem:[#allocation13 + $0x20] sm:$0xff] }
  0x9d   : > { %5628 = vmatpush.bf16.msra.mxu1 %v4941_v2  ;;  %5629 = vmatpush.bf16.msra.mxu2 %v4941_v2  ;;  %v4907_v28 = vld [vmem:[%s6468_s29 + $0x118] sm:$0xff]  ;;  %v4990_v30 = vld [vmem:[#allocation11 + $0x70] sm:$0xff]  ;;  %v4917_v31 = vld [vmem:[%s6468_s29 + $0x168] sm:$0xff] }
  0x9e   : > { %v4980_v32 = vld [vmem:[#allocation11 + $0x20] sm:$0xff]  ;;  %v4927_v34 = vld [vmem:[%s6468_s29 + $0x1b8] sm:$0xff]  ;;  %v4989_v36 = vld [vmem:[#allocation11 + $0x68] sm:$0xff] }
  0x9f   : > { %v4876_v33 = vld [vmem:[%s6468_s29 + $0x20] sm:$0xff]  ;;  %v5011_v37 = vld [vmem:[#allocation13 + $0x18] sm:$0xff]  ;;  %v4918_v38 = vld [vmem:[%s6468_s29 + $0x170] sm:$0xff] }
  0xa0   : > { %1203 = vmatpush.bf16.msra.mxu0 %v4940_v3  ;;  %5633 = vmatpush.bf16.msra.mxu3 %v4940_v3  ;;  %v4908_v35 = vld [vmem:[%s6468_s29 + $0x120] sm:$0xff]  ;;  %v4877_v39 = vld [vmem:[%s6468_s29 + $0x28] sm:$0xff]  ;;  %v4979_v42 = vld [vmem:[#allocation11 + $0x18] sm:$0xff] }
  0xa1   : > { %5631 = vmatpush.bf16.msra.mxu1 %v4940_v3  ;;  %5632 = vmatpush.bf16.msra.mxu2 %v4940_v3  ;;  %v4928_v40 = vld [vmem:[%s6468_s29 + $0x1c0] sm:$0xff]  ;;  %v4909_v41 = vld [vmem:[%s6468_s29 + $0x128] sm:$0xff]  ;;  %v4878_v44 = vld [vmem:[%s6468_s29 + $0x30] sm:$0xff] }
  0xa2   : > { %v4988_v43 = vld [vmem:[#allocation11 + $0x60] sm:$0xff]  ;;  %v4929_v45 = vld [vmem:[%s6468_s29 + $0x1c8] sm:$0xff]  ;;  %v4919_v46 = vld [vmem:[%s6468_s29 + $0x178] sm:$0xff] }
  0xa3   : > { %v4910_v47 = vld [vmem:[%s6468_s29 + $0x130] sm:$0xff]  ;;  %v4987_v49 = vld [vmem:[#allocation11 + $0x58] sm:$0xff]  ;;  %v4920_v53 = vld [vmem:[%s6468_s29 + $0x180] sm:$0xff] }
  0xa4   : > { %1204 = vmatpush.bf16.msra.mxu0 %v4939_v4  ;;  %5636 = vmatpush.bf16.msra.mxu3 %v4939_v4  ;;  %v5010_v48 = vld [vmem:[#allocation13 + $0x10] sm:$0xff]  ;;  %v4879_v51 = vld [vmem:[%s6468_s29 + $0x38] sm:$0xff]  ;;  %v4880_v56 = vld [vmem:[%s6468_s29 + $0x40] sm:$0xff] }
  0xa5   : > { %5634 = vmatpush.bf16.msra.mxu1 %v4939_v4  ;;  %5635 = vmatpush.bf16.msra.mxu2 %v4939_v4  ;;  %v4978_v50 = vld [vmem:[#allocation11 + $0x10] sm:$0xff]  ;;  %v4911_v54 = vld [vmem:[%s6468_s29 + $0x138] sm:$0xff]  ;;  %v4921_v58 = vld [vmem:[%s6468_s29 + $0x188] sm:$0xff] }
  0xa6   : > { %v4930_v52 = vld [vmem:[%s6468_s29 + $0x1d0] sm:$0xff]  ;;  %v4931_v57 = vld [vmem:[%s6468_s29 + $0x1d8] sm:$0xff]  ;;  %v4912_v60 = vld [vmem:[%s6468_s29 + $0x140] sm:$0xff] }
  0xa7   : > { %v4986_v55 = vld [vmem:[#allocation11 + $0x50] sm:$0xff]  ;;  %v4977_v62 = vld [vmem:[#allocation11 + $0x8] sm:$0xff] }
  0xa8   : > { %1205 = vmatpush.bf16.msra.mxu0 %v4938_v5  ;;  %5639 = vmatpush.bf16.msra.mxu3 %v4938_v5  ;;  %v5009_v63 = vld [vmem:[#allocation13 + $0x8] sm:$0xff] }
  0xa9   : > { %5637 = vmatpush.bf16.msra.mxu1 %v4938_v5  ;;  %5638 = vmatpush.bf16.msra.mxu2 %v4938_v5  ;;  %v4985_v5 = vld [vmem:[#allocation11 + $0x48] sm:$0xff] }
  0xac   : > { %1206 = vmatpush.bf16.msra.mxu0 %v4937_v6  ;;  %5642 = vmatpush.bf16.msra.mxu3 %v4937_v6 }
  0xad   : > { %5640 = vmatpush.bf16.msra.mxu1 %v4937_v6  ;;  %5641 = vmatpush.bf16.msra.mxu2 %v4937_v6 }
  0xb0   : > { %1207 = vmatpush.bf16.msra.mxu0 %v4936_v7  ;;  %5645 = vmatpush.bf16.msra.mxu3 %v4936_v7 }
  0xb1   : > { %5643 = vmatpush.bf16.msra.mxu1 %v4936_v7  ;;  %5644 = vmatpush.bf16.msra.mxu2 %v4936_v7 }
  0xb3   : > { %1208 = vmatmul.bf16.vlgmr.msra.gmra.mxu0 %v4872_v10  ;;  %1463 = vmatmul.bf16.vlgmr.msra.gmra.mxu3 %v4923_v11  ;;  %v4922_v10 = vld [vmem:[%s6468_s29 + $0x190] sm:$0xff] }
  0xb4   : > { %2699 = vmatpush.bf16.msrb.mxu3 %v5015_v8  ;;  %1368 = vmatmul.bf16.vlgmr.msra.gmra.mxu1 %v4904_v12  ;;  %v4881_v8 = vld [vmem:[%s6468_s29 + $0x48] sm:$0xff] }
  0xb5   : > { %2105 = vmatpush.bf16.msrb.mxu1 %v4983_v9  ;;  %1423 = vmatmul.bf16.vlgmr.msra.gmra.mxu2 %v4915_v19  ;;  %v4932_v9 = vld [vmem:[%s6468_s29 + $0x1e0] sm:$0xff]  ;;  %v4913_v12 = vld [vmem:[%s6468_s29 + $0x148] sm:$0xff] }
  0xb6   : > { %2194 = vmatpush.bf16.msrb.mxu2 %v4991_v24  ;;  %v4976_v19 = vld [vmem:[#allocation11] sm:$0xff]  ;;  %v4186_v24 = vld [vmem:[%s6479_s22 + $0x8] sm:$0xf0] }
  0xb8   : > { %2700 = vmatpush.bf16.msrb.mxu3 %v5014_v13 }
  0xb9   : > { %2106 = vmatpush.bf16.msrb.mxu1 %v4982_v17 }
  0xba   : > { %2195 = vmatpush.bf16.msrb.mxu2 %v4990_v30  ;;  %v4914_v30 = vld [vmem:[%s6468_s29 + $0x150] sm:$0xff] }
  0xbc   : > { %2701 = vmatpush.bf16.msrb.mxu3 %v5013_v18 }
  0xbd   : > { %2107 = vmatpush.bf16.msrb.mxu1 %v4981_v23  ;;  %v4944_v23 = vld [vmem:[%s6479_s22 + $0x4] sm:$0xf] }
  0xbe   : > { %2196 = vmatpush.bf16.msrb.mxu2 %v4989_v36 }
  0xc0   : > { %2702 = vmatpush.bf16.msrb.mxu3 %v5012_v29 }
  0xc1   : > { %2108 = vmatpush.bf16.msrb.mxu1 %v4980_v32 }
  0xc2   : > { %2197 = vmatpush.bf16.msrb.mxu2 %v4988_v43 }
  0xc3   : > { %1213 = vmatmul.bf16.gmra.mxu0 %v4873_v14  ;;  %1468 = vmatmul.bf16.gmra.mxu3 %v4924_v15 }
  0xc4   : > { %1373 = vmatmul.bf16.gmra.mxu1 %v4905_v16  ;;  %2703 = vmatpush.bf16.msrb.mxu3 %v5011_v37 }
  0xc5   : > { %1428 = vmatmul.bf16.gmra.mxu2 %v4916_v25  ;;  %2109 = vmatpush.bf16.msrb.mxu1 %v4979_v42  ;;  %v4945_v42 = vld [vmem:[%s6479_s22 + $0x4] sm:$0xf0] }
  0xc6   : > { %2198 = vmatpush.bf16.msrb.mxu2 %v4987_v49 }
  0xc8   : > { %2704 = vmatpush.bf16.msrb.mxu3 %v5010_v48  ;;  %v4934_v48 = vld [vmem:[%s6468_s29 + $0x1f0] sm:$0xff] }
  0xc9   : > { %2110 = vmatpush.bf16.msrb.mxu1 %v4978_v50 }
  0xca   : > { %2199 = vmatpush.bf16.msrb.mxu2 %v4986_v55 }
  0xcc   : > { %2705 = vmatpush.bf16.msrb.mxu3 %v5009_v63  ;;  %v4192_v63 = vld [vmem:[%s6479_s22 + $0x10] sm:$0xf] }
  0xcd   : > { %2111 = vmatpush.bf16.msrb.mxu1 %v4977_v62 }
  0xce   : > { %2200 = vmatpush.bf16.msrb.mxu2 %v4985_v5  ;;  %v4884_v5 = vld [vmem:[%s6468_s29 + $0x60] sm:$0xff] }
  0xd1   : > { %2112 = vmatpush.bf16.msrb.mxu1 %v4976_v19  ;;  %v5062_v19 = vld [vmem:[#allocation14 + $0x70] sm:$0xff] }
  0xd3   : > { %1218 = vmatmul.bf16.gmra.mxu0 %v4874_v20  ;;  %1473 = vmatmul.bf16.gmra.mxu3 %v4925_v21  ;;  %v4984_v20 = vld [vmem:[#allocation11 + $0x40] sm:$0xff] }
  0xd4   : > { %1378 = vmatmul.bf16.gmra.mxu1 %v4906_v22  ;;  %v5008_v21 = vld [vmem:[#allocation13] sm:$0xff]  ;;  %2201 = vmatpush.bf16.msrb.mxu2 %v4984_v20 }
  0xd5   : > { %1433 = vmatmul.bf16.gmra.mxu2 %v4917_v31  ;;  %2706 = vmatpush.bf16.msrb.mxu3 %v5008_v21  ;;  %v4376_v21 = vld [vmem:[%s6489_s15] sm:$0xf] }
  0xe3   : > { %1223 = vmatmul.bf16.gmra.mxu0 %v4875_v26  ;;  %1478 = vmatmul.bf16.gmra.mxu3 %v4926_v27  ;;  %v4882_v26 = vld [vmem:[%s6468_s29 + $0x50] sm:$0xff]  ;;  %v4933_v27 = vld [vmem:[%s6468_s29 + $0x1e8] sm:$0xff] }
  0xe4   : > { %1383 = vmatmul.bf16.gmra.mxu1 %v4907_v28  ;;  %v4189_v28 = vor.u32 %v4944_v23, %v4186_v24  ;;  %v4200_v24 = vld [vmem:[%s6479_s22 + $0x20] sm:$0xf] }
  0xe5   : > { %1438 = vmatmul.bf16.gmra.mxu2 %v4918_v38  ;;  %v5063_v38 = vld [vmem:[#allocation14 + $0x78] sm:$0xff] }
  0xe6   : > { %3405 = vmatpush.bf16.msra.mxu2 %v5063_v38 }
  0xea   : > { %3406 = vmatpush.bf16.msra.mxu2 %v5062_v19 }
  0xf3   : > { %1228 = vmatmul.bf16.gmra.mxu0 %v4876_v33  ;;  %1483 = vmatmul.bf16.gmra.mxu3 %v4927_v34 }
  0xf4   : > { %1388 = vmatmul.bf16.gmra.mxu1 %v4908_v35 }
  0xf5   : > { %1443 = vmatmul.bf16.gmra.mxu2 %v4919_v46 }
 0x103   : > { %1233 = vmatmul.bf16.gmra.mxu0 %v4877_v39  ;;  %1488 = vmatmul.bf16.gmra.mxu3 %v4928_v40 }
 0x104   : > { %1393 = vmatmul.bf16.gmra.mxu1 %v4909_v41  ;;  %v4184_v41 = vld [vmem:[%s6479_s22] sm:$0xf] }
 0x105   : > { %1448 = vmatmul.bf16.gmra.mxu2 %v4920_v53  ;;  %v5055_v53 = vld [vmem:[#allocation14 + $0x38] sm:$0xff] }
 0x106   : > { %3391 = vmatpush.bf16.msra.mxu1 %v5055_v53  ;;  %v4218_v53 = vld [vmem:[%s6479_s22 + $0x48] sm:$0xf0] }
 0x113   : > { %1238 = vmatmul.bf16.gmra.mxu0 %v4878_v44  ;;  %1493 = vmatmul.bf16.gmra.mxu3 %v4929_v45  ;;  %v4946_v44 = vld [vmem:[%s6479_s22 + $0x14] sm:$0xf]  ;;  %v4194_v45 = vld [vmem:[%s6479_s22 + $0x18] sm:$0xf0] }
 0x114   : > { %1398 = vmatmul.bf16.gmra.mxu1 %v4910_v47  ;;  %v4883_v47 = vld [vmem:[%s6468_s29 + $0x58] sm:$0xff]  ;;  %v4197_v49 = vor.u32 %v4946_v44, %v4194_v45 }
 0x115   : > { %1453 = vmatmul.bf16.gmra.mxu2 %v4921_v58 }
 0x123   : > { %1243 = vmatmul.bf16.gmra.mxu0 %v4879_v51  ;;  %1498 = vmatmul.bf16.gmra.mxu3 %v4930_v52  ;;  %v4185_v51 = vor.u32 %v4945_v42, %v4184_v41 }
 0x124   : > { %1403 = vmatmul.bf16.gmra.mxu1 %v4911_v54 }
 0x125   : > { %1458 = vmatmul.bf16.gmra.mxu2 %v4922_v10 }
 0x130   : > { %v1209_v59 = vpop.f32.mrf.mxu0 }
 0x131   : > { %v1369_v61 = vpop.f32.mrf.mxu1 }
 0x133   : > { %1248 = vmatmul.bf16.gmra.mxu0 %v4880_v56  ;;  %1503 = vmatmul.bf16.gmra.mxu3 %v4931_v57  ;;  %v5023_v56 = vld [vmem:[#allocation13 + $0x78] sm:$0xff] }
 0x134   : > { %1408 = vmatmul.bf16.gmra.mxu1 %v4912_v60  ;;  %2728 = vmatpush.bf16.msra.mxu3 %v5023_v56 }
 0x135   : > { %2202 = vmatmul.bf16.vlgmr.msrb.gmra.mxu2 %v4189_v28  ;;  %v4210_v28 = vld [vmem:[%s6479_s22 + $0x38] sm:$0xf0] }
 0x136   : > { %v1464_v0 = vpop.f32.mrf.mxu3 }
 0x138   : > { %v1211_v1 = vpop.f32.mrf.mxu0  ;;  %v1424_v32 = vpop.f32.mrf.mxu2 }
 0x139   : > { %v5119_v2 = vpack.c.bf16 %v1211_v1, %v1209_v59  ;;  %v1371_v3 = vpop.f32.mrf.mxu1 }
 0x13a   : > { %v5279_v4 = vpack.c.bf16 %v1371_v3, %v1369_v61  ;;  %v4202_v3 = vld [vmem:[%s6479_s22 + $0x28] sm:$0xf0] }
 0x13b   : > { %5120 = vst [vmem:[%s6546_s23] sm:$0xff] %v5119_v2   ;;  %v4948_v2 = vld [vmem:[%s6479_s22 + $0x24] sm:$0xf] }
 0x13c   : > { %5572 = vst [vmem:[%s6546_s23 + $0x100] sm:$0xff] %v5279_v4  }
 0x13e   : > { %v1466_v6 = vpop.f32.mrf.mxu3 }
 0x13f   : > { %v5374_v7 = vpack.c.bf16 %v1466_v6, %v1464_v0  ;;  %v4947_v0 = vld [vmem:[%s6479_s22 + $0x14] sm:$0xf0] }
 0x140   : > { %v1214_v11 = vpop.f32.mrf.mxu0  ;;  %v1426_v39 = vpop.f32.mrf.mxu2  ;;  %v4935_v6 = vld [vmem:[%s6468_s29 + $0x1f8] sm:$0xff] }
 0x141   : > { %5591 = vst [vmem:[%s6546_s23 + $0x198] sm:$0xff] %v5374_v7   ;;  %v1374_v13 = vpop.f32.mrf.mxu1  ;;  %v5334_v40 = vpack.c.bf16 %v1426_v39, %v1424_v32  ;;  %v4205_v7 = vor.u32 %v4948_v2, %v4202_v3 }
 0x143   : > { %1253 = vmatmul.bf16.gmra.mxu0 %v4881_v8  ;;  %1508 = vmatmul.bf16.gmra.mxu3 %v4932_v9  ;;  %5583 = vst [vmem:[%s6546_s23 + $0x158] sm:$0xff] %v5334_v40   ;;  %v4193_v9 = vor.u32 %v4947_v0, %v4192_v63  ;;  %v5019_v40 = vld [vmem:[#allocation13 + $0x58] sm:$0xff]  ;;  %v5017_v0 = vld [vmem:[#allocation13 + $0x48] sm:$0xff] }
 0x144   : > { %1413 = vmatmul.bf16.gmra.mxu1 %v4913_v12 }
 0x145   : > { %2207 = vmatmul.bf16.gmra.mxu2 %v4197_v49  ;;  %v4208_v49 = vld [vmem:[%s6479_s22 + $0x30] sm:$0xf] }
 0x146   : > { %v1469_v14 = vpop.f32.mrf.mxu3 }
 0x148   : > { %v1216_v15 = vpop.f32.mrf.mxu0  ;;  %v1429_v54 = vpop.f32.mrf.mxu2 }
 0x149   : > { %v5124_v16 = vpack.c.bf16 %v1216_v15, %v1214_v11  ;;  %v1376_v17 = vpop.f32.mrf.mxu1  ;;  %v5022_v11 = vld [vmem:[#allocation13 + $0x70] sm:$0xff] }
 0x14a   : > { %v5284_v18 = vpack.c.bf16 %v1376_v17, %v1374_v13  ;;  %2729 = vmatpush.bf16.msra.mxu3 %v5022_v11 }
 0x14b   : > { %5541 = vst [vmem:[%s6546_s23 + $0x8] sm:$0xff] %v5124_v16  }
 0x14c   : > { %5573 = vst [vmem:[%s6546_s23 + $0x108] sm:$0xff] %v5284_v18  }
 0x14e   : > { %v1471_v22 = vpop.f32.mrf.mxu3 }
 0x14f   : > { %v5379_v25 = vpack.c.bf16 %v1471_v22, %v1469_v14  ;;  %v5021_v14 = vld [vmem:[#allocation13 + $0x68] sm:$0xff]  ;;  %v4994_v22 = vld [vmem:[%s6489_s15 + $0xc] sm:$0xf0] }
 0x150   : > { %v1219_v29 = vpop.f32.mrf.mxu0  ;;  %v1431_v61 = vpop.f32.mrf.mxu2  ;;  %2730 = vmatpush.bf16.msra.mxu3 %v5021_v14  ;;  %v4954_v14 = vld [vmem:[%s6479_s22 + $0x54] sm:$0xf] }
 0x151   : > { %5592 = vst [vmem:[%s6546_s23 + $0x1a0] sm:$0xff] %v5379_v25   ;;  %v1379_v31 = vpop.f32.mrf.mxu1  ;;  %v5339_v62 = vpack.c.bf16 %v1431_v61, %v1429_v54  ;;  %v4949_v25 = vld [vmem:[%s6479_s22 + $0x24] sm:$0xf0]  ;;  %v5018_v61 = vld [vmem:[#allocation13 + $0x50] sm:$0xff] }
 0x153   : > { %1258 = vmatmul.bf16.gmra.mxu0 %v4882_v26  ;;  %1513 = vmatmul.bf16.gmra.mxu3 %v4933_v27  ;;  %5584 = vst [vmem:[%s6546_s23 + $0x160] sm:$0xff] %v5339_v62   ;;  %v4950_v27 = vld [vmem:[%s6479_s22 + $0x34] sm:$0xf] }
 0x154   : > { %1418 = vmatmul.bf16.gmra.mxu1 %v4914_v30  ;;  %v4885_v30 = vld [vmem:[%s6468_s29 + $0x68] sm:$0xff]  ;;  %v4213_v32 = vor.u32 %v4950_v27, %v4210_v28 }
 0x155   : > { %2212 = vmatmul.bf16.gmra.mxu2 %v4205_v7  ;;  %v5002_v7 = vld [vmem:[%s6489_s15 + $0x4c] sm:$0xf0] }
 0x156   : > { %v1474_v33 = vpop.f32.mrf.mxu3 }
 0x158   : > { %v1221_v34 = vpop.f32.mrf.mxu0  ;;  %v1434_v12 = vpop.f32.mrf.mxu2 }
 0x159   : > { %v5129_v35 = vpack.c.bf16 %v1221_v34, %v1219_v29  ;;  %v1381_v36 = vpop.f32.mrf.mxu1  ;;  %v4201_v34 = vor.u32 %v4949_v25, %v4200_v24 }
 0x15a   : > { %v5289_v37 = vpack.c.bf16 %v1381_v36, %v1379_v31  ;;  %v4377_v31 = vor.u32 %v4994_v22, %v4376_v21  ;;  %v5020_v36 = vld [vmem:[#allocation13 + $0x60] sm:$0xff] }
 0x15b   : > { %5542 = vst [vmem:[%s6546_s23 + $0x10] sm:$0xff] %v5129_v35   ;;  %2731 = vmatpush.bf16.msra.mxu3 %v5020_v36 }
 0x15c   : > { %5574 = vst [vmem:[%s6546_s23 + $0x110] sm:$0xff] %v5289_v37   ;;  %v5054_v37 = vld [vmem:[#allocation14 + $0x30] sm:$0xff] }
 0x15d   : > { %3392 = vmatpush.bf16.msra.mxu1 %v5054_v37 }
 0x15e   : > { %v1476_v43 = vpop.f32.mrf.mxu3 }
 0x15f   : > { %v5384_v46 = vpack.c.bf16 %v1476_v43, %v1474_v33  ;;  %2732 = vmatpush.bf16.msra.mxu3 %v5019_v40 }
 0x160   : > { %v1224_v50 = vpop.f32.mrf.mxu0  ;;  %v1436_v20 = vpop.f32.mrf.mxu2 }
 0x161   : > { %5593 = vst [vmem:[%s6546_s23 + $0x1a8] sm:$0xff] %v5384_v46   ;;  %v1384_v52 = vpop.f32.mrf.mxu1  ;;  %v5344_v23 = vpack.c.bf16 %v1436_v20, %v1434_v12  ;;  %v4392_v46 = vld [vmem:[%s6489_s15 + $0x20] sm:$0xf] }
 0x163   : > { %1263 = vmatmul.bf16.gmra.mxu0 %v4883_v47  ;;  %1518 = vmatmul.bf16.gmra.mxu3 %v4934_v48  ;;  %5585 = vst [vmem:[%s6546_s23 + $0x168] sm:$0xff] %v5344_v23   ;;  %v4998_v47 = vld [vmem:[%s6489_s15 + $0x2c] sm:$0xf0]  ;;  %v5053_v23 = vld [vmem:[#allocation14 + $0x28] sm:$0xff] }
 0x164   : > { %2113 = vmatmul.bf16.vlgmr.msrb.gmra.mxu1 %v4185_v51  ;;  %v4393_v56 = vor.u32 %v4998_v47, %v4392_v46  ;;  %2733 = vmatpush.bf16.msra.mxu3 %v5018_v61  ;;  %v5030_v47 = vld [vmem:[#allocation13 + $0xb0] sm:$0xff] }
 0x165   : > { %2217 = vmatmul.bf16.gmra.mxu2 %v4213_v32  ;;  %3393 = vmatpush.bf16.msra.mxu1 %v5053_v23  ;;  %v5006_v32 = vld [vmem:[%s6489_s15 + $0x6c] sm:$0xf0] }
 0x166   : > { %v1479_v55 = vpop.f32.mrf.mxu3 }
 0x168   : > { %v1226_v57 = vpop.f32.mrf.mxu0  ;;  %v1439_v38 = vpop.f32.mrf.mxu2  ;;  %2734 = vmatpush.bf16.msra.mxu3 %v5017_v0  ;;  %v4242_v0 = vld [vmem:[%s6479_s22 + $0x78] sm:$0xf0] }
 0x169   : > { %v5134_v58 = vpack.c.bf16 %v1226_v57, %v1224_v50  ;;  %v1386_v59 = vpop.f32.mrf.mxu1  ;;  %v4951_v50 = vld [vmem:[%s6479_s22 + $0x34] sm:$0xf0] }
 0x16a   : > { %v5294_v60 = vpack.c.bf16 %v1386_v59, %v1384_v52  ;;  %v4952_v52 = vld [vmem:[%s6479_s22 + $0x44] sm:$0xf]  ;;  %v4209_v59 = vor.u32 %v4951_v50, %v4208_v49  ;;  %v5029_v50 = vld [vmem:[#allocation13 + $0xa8] sm:$0xff] }
 0x16b   : > { %5543 = vst [vmem:[%s6546_s23 + $0x18] sm:$0xff] %v5134_v58   ;;  %v4221_v57 = vor.u32 %v4952_v52, %v4218_v53 }
 0x16c   : > { %5575 = vst [vmem:[%s6546_s23 + $0x118] sm:$0xff] %v5294_v60  }
 0x16e   : > { %v1481_v1 = vpop.f32.mrf.mxu3 }
 0x16f   : > { %v5389_v4 = vpack.c.bf16 %v1481_v1, %v1479_v55  ;;  %v4886_v55 = vld [vmem:[%s6468_s29 + $0x70] sm:$0xff] }
 0x170   : > { %v1229_v8 = vpop.f32.mrf.mxu0  ;;  %v1441_v45 = vpop.f32.mrf.mxu2 }
 0x171   : > { %5594 = vst [vmem:[%s6546_s23 + $0x1b0] sm:$0xff] %v5389_v4   ;;  %v1389_v10 = vpop.f32.mrf.mxu1  ;;  %v5349_v48 = vpack.c.bf16 %v1441_v45, %v1439_v38  ;;  %v4956_v38 = vld [vmem:[%s6479_s22 + $0x64] sm:$0xf] }
 0x173   : > { %1268 = vmatmul.bf16.gmra.mxu0 %v4884_v5  ;;  %1523 = vmatmul.bf16.gmra.mxu3 %v4935_v6  ;;  %5586 = vst [vmem:[%s6546_s23 + $0x170] sm:$0xff] %v5349_v48   ;;  %v5061_v5 = vld [vmem:[#allocation14 + $0x68] sm:$0xff]  ;;  %v4408_v6 = vld [vmem:[%s6489_s15 + $0x40] sm:$0xf] }
 0x174   : > { %2118 = vmatmul.bf16.gmra.mxu1 %v4193_v9  ;;  %v4216_v9 = vld [vmem:[%s6479_s22 + $0x40] sm:$0xf]  ;;  %3407 = vmatpush.bf16.msra.mxu2 %v5061_v5 }
 0x175   : > { %2222 = vmatmul.bf16.gmra.mxu2 %v4221_v57  ;;  %v4378_v57 = vld [vmem:[%s6489_s15 + $0x10] sm:$0xf0] }
 0x176   : > { %v1484_v13 = vpop.f32.mrf.mxu3 }
 0x178   : > { %v1231_v15 = vpop.f32.mrf.mxu0  ;;  %v1444_v62 = vpop.f32.mrf.mxu2 }
 0x179   : > { %v5139_v16 = vpack.c.bf16 %v1231_v15, %v1229_v8  ;;  %v1391_v17 = vpop.f32.mrf.mxu1  ;;  %v4226_v15 = vld [vmem:[%s6479_s22 + $0x58] sm:$0xf0] }
 0x17a   : > { %v5299_v18 = vpack.c.bf16 %v1391_v17, %v1389_v10  ;;  %v4953_v10 = vld [vmem:[%s6479_s22 + $0x44] sm:$0xf0]  ;;  %v4887_v17 = vld [vmem:[%s6468_s29 + $0x78] sm:$0xff]  ;;  %v4229_v19 = vor.u32 %v4954_v14, %v4226_v15 }
 0x17b   : > { %5544 = vst [vmem:[%s6546_s23 + $0x20] sm:$0xff] %v5139_v16   ;;  %v4217_v21 = vor.u32 %v4953_v10, %v4216_v9  ;;  %v5052_v9 = vld [vmem:[#allocation14 + $0x20] sm:$0xff] }
 0x17c   : > { %5576 = vst [vmem:[%s6546_s23 + $0x120] sm:$0xff] %v5299_v18   ;;  %v4409_v18 = vor.u32 %v5002_v7, %v4408_v6  ;;  %3394 = vmatpush.bf16.msra.mxu1 %v5052_v9 }
 0x17e   : > { %v1486_v26 = vpop.f32.mrf.mxu3 }
 0x17f   : > { %v5394_v29 = vpack.c.bf16 %v1486_v26, %v1484_v13  ;;  %v5016_v13 = vld [vmem:[#allocation13 + $0x40] sm:$0xff]  ;;  %v5031_v26 = vld [vmem:[#allocation13 + $0xb8] sm:$0xff] }
 0x180   : > { %v1234_v33 = vpop.f32.mrf.mxu0  ;;  %v1446_v8 = vpop.f32.mrf.mxu2  ;;  %2735 = vmatpush.bf16.msra.mxu3 %v5016_v13 }
 0x181   : > { %5595 = vst [vmem:[%s6546_s23 + $0x1b8] sm:$0xff] %v5394_v29   ;;  %v1394_v35 = vpop.f32.mrf.mxu1  ;;  %v5354_v11 = vpack.c.bf16 %v1446_v8, %v1444_v62  ;;  %v5028_v8 = vld [vmem:[#allocation13 + $0xa0] sm:$0xff] }
 0x183   : > { %1273 = vmatmul.bf16.gmra.mxu0 %v4885_v30  ;;  %2707 = vmatmul.bf16.vlgmr.msrb.gmra.mxu3 %v4377_v31  ;;  %5587 = vst [vmem:[%s6546_s23 + $0x178] sm:$0xff] %v5354_v11   ;;  %v4424_v31 = vld [vmem:[%s6489_s15 + $0x60] sm:$0xf] }
 0x184   : > { %2123 = vmatmul.bf16.gmra.mxu1 %v4201_v34  ;;  %2757 = vmatpush.bf16.msrb.mxu3 %v5031_v26  ;;  %v4224_v34 = vld [vmem:[%s6479_s22 + $0x50] sm:$0xf] }
 0x185   : > { %2227 = vmatmul.bf16.gmra.mxu2 %v4229_v19 }
 0x186   : > { %v1489_v39 = vpop.f32.mrf.mxu3 }
 0x188   : > { %v1236_v41 = vpop.f32.mrf.mxu0  ;;  %v1449_v24 = vpop.f32.mrf.mxu2  ;;  %2758 = vmatpush.bf16.msrb.mxu3 %v5030_v47 }
 0x189   : > { %v5144_v42 = vpack.c.bf16 %v1236_v41, %v1234_v33  ;;  %v1396_v43 = vpop.f32.mrf.mxu1  ;;  %v4888_v41 = vld [vmem:[%s6468_s29 + $0x80] sm:$0xff] }
 0x18a   : > { %v5304_v44 = vpack.c.bf16 %v1396_v43, %v1394_v35  ;;  %v4955_v35 = vld [vmem:[%s6479_s22 + $0x54] sm:$0xf0] }
 0x18b   : > { %5545 = vst [vmem:[%s6546_s23 + $0x28] sm:$0xff] %v5144_v42   ;;  %v4425_v42 = vor.u32 %v5006_v32, %v4424_v31  ;;  %v4225_v45 = vor.u32 %v4955_v35, %v4224_v34 }
 0x18c   : > { %5577 = vst [vmem:[%s6546_s23 + $0x128] sm:$0xff] %v5304_v44   ;;  %2759 = vmatpush.bf16.msrb.mxu3 %v5029_v50  ;;  %v4258_v50 = vld [vmem:[%s6479_s22 + $0x98] sm:$0xf0] }
 0x18e   : > { %v1491_v51 = vpop.f32.mrf.mxu3 }
 0x18f   : > { %v5399_v54 = vpack.c.bf16 %v1491_v51, %v1489_v39  ;;  %v4234_v39 = vld [vmem:[%s6479_s22 + $0x68] sm:$0xf0] }
 0x190   : > { %v1239_v58 = vpop.f32.mrf.mxu0  ;;  %v1451_v33 = vpop.f32.mrf.mxu2  ;;  %v4237_v43 = vor.u32 %v4956_v38, %v4234_v39  ;;  %2760 = vmatpush.bf16.msrb.mxu3 %v5028_v8  ;;  %v4963_v8 = vld [vmem:[%s6479_s22 + $0x94] sm:$0xf0] }
 0x191   : > { %5596 = vst [vmem:[%s6546_s23 + $0x1c0] sm:$0xff] %v5399_v54   ;;  %v1399_v60 = vpop.f32.mrf.mxu1  ;;  %v5359_v36 = vpack.c.bf16 %v1451_v33, %v1449_v24  ;;  %v4960_v24 = vld [vmem:[%s6479_s22 + $0x84] sm:$0xf]  ;;  %v5026_v33 = vld [vmem:[#allocation13 + $0x90] sm:$0xff] }
 0x193   : > { %1278 = vmatmul.bf16.gmra.mxu0 %v4886_v55  ;;  %2712 = vmatmul.bf16.gmra.mxu3 %v4393_v56  ;;  %5588 = vst [vmem:[%s6546_s23 + $0x180] sm:$0xff] %v5359_v36   ;;  %v5060_v55 = vld [vmem:[#allocation14 + $0x60] sm:$0xff]  ;;  %v5025_v36 = vld [vmem:[#allocation13 + $0x88] sm:$0xff] }
 0x194   : > { %2128 = vmatmul.bf16.gmra.mxu1 %v4209_v59  ;;  %v4992_v56 = vld [vmem:[%s6489_s15 + $0x4] sm:$0xf]  ;;  %v4232_v59 = vld [vmem:[%s6479_s22 + $0x60] sm:$0xf]  ;;  %3408 = vmatpush.bf16.msra.mxu2 %v5060_v55 }
 0x195   : > { %2232 = vmatmul.bf16.gmra.mxu2 %v4237_v43  ;;  %v4410_v43 = vld [vmem:[%s6489_s15 + $0x50] sm:$0xf0] }
 0x196   : > { %v1494_v63 = vpop.f32.mrf.mxu3 }
 0x198   : > { %v1241_v1 = vpop.f32.mrf.mxu0  ;;  %v1454_v48 = vpop.f32.mrf.mxu2 }
 0x199   : > { %v5149_v2 = vpack.c.bf16 %v1241_v1, %v1239_v58  ;;  %v1401_v3 = vpop.f32.mrf.mxu1 }
 0x19a   : > { %v5309_v4 = vpack.c.bf16 %v1401_v3, %v1399_v60  ;;  %v4957_v60 = vld [vmem:[%s6479_s22 + $0x64] sm:$0xf0]  ;;  %v4381_v3 = vor.u32 %v4992_v56, %v4378_v57 }
 0x19b   : > { %5546 = vst [vmem:[%s6546_s23 + $0x30] sm:$0xff] %v5149_v2   ;;  %v4889_v2 = vld [vmem:[%s6468_s29 + $0x88] sm:$0xff]  ;;  %v4233_v6 = vor.u32 %v4957_v60, %v4232_v59 }
 0x19c   : > { %5578 = vst [vmem:[%s6546_s23 + $0x130] sm:$0xff] %v5309_v4  }
 0x19e   : > { %v1496_v12 = vpop.f32.mrf.mxu3 }
 0x19f   : > { %v5404_v16 = vpack.c.bf16 %v1496_v12, %v1494_v63  ;;  %v4958_v63 = vld [vmem:[%s6479_s22 + $0x74] sm:$0xf]  ;;  %v5027_v12 = vld [vmem:[#allocation13 + $0x98] sm:$0xff] }
 0x1a0   : > { %v1244_v20 = vpop.f32.mrf.mxu0  ;;  %v1456_v58 = vpop.f32.mrf.mxu2  ;;  %v4245_v4 = vor.u32 %v4958_v63, %v4242_v0  ;;  %2761 = vmatpush.bf16.msrb.mxu3 %v5027_v12  ;;  %v4266_v12 = vld [vmem:[%s6479_s22 + $0xa8] sm:$0xf0] }
 0x1a1   : > { %5597 = vst [vmem:[%s6546_s23 + $0x1c8] sm:$0xff] %v5404_v16   ;;  %v1404_v22 = vpop.f32.mrf.mxu1  ;;  %v5364_v61 = vpack.c.bf16 %v1456_v58, %v1454_v48  ;;  %v5024_v48 = vld [vmem:[#allocation13 + $0x80] sm:$0xff]  ;;  %v5051_v58 = vld [vmem:[#allocation14 + $0x18] sm:$0xff] }
 0x1a2   : > { %3395 = vmatpush.bf16.msra.mxu1 %v5051_v58 }
 0x1a3   : > { %1283 = vmatmul.bf16.gmra.mxu0 %v4887_v17  ;;  %2717 = vmatmul.bf16.gmra.mxu3 %v4409_v18  ;;  %5589 = vst [vmem:[%s6546_s23 + $0x188] sm:$0xff] %v5364_v61   ;;  %v4996_v17 = vld [vmem:[%s6489_s15 + $0x24] sm:$0xf]  ;;  %v4394_v18 = vld [vmem:[%s6489_s15 + $0x30] sm:$0xf0]  ;;  %v5039_v61 = vld [vmem:[#allocation13 + $0xf8] sm:$0xff] }
 0x1a4   : > { %2133 = vmatmul.bf16.gmra.mxu1 %v4217_v21  ;;  %v4959_v21 = vld [vmem:[%s6479_s22 + $0x74] sm:$0xf0]  ;;  %2762 = vmatpush.bf16.msrb.mxu3 %v5026_v33  ;;  %v4264_v33 = vld [vmem:[%s6479_s22 + $0xa0] sm:$0xf] }
 0x1a5   : > { %2237 = vmatmul.bf16.gmra.mxu2 %v4245_v4  ;;  %v4426_v4 = vld [vmem:[%s6489_s15 + $0x70] sm:$0xf0] }
 0x1a6   : > { %v1499_v25 = vpop.f32.mrf.mxu3 }
 0x1a8   : > { %v1246_v27 = vpop.f32.mrf.mxu0  ;;  %v1459_v10 = vpop.f32.mrf.mxu2  ;;  %2763 = vmatpush.bf16.msrb.mxu3 %v5025_v36  ;;  %v5036_v36 = vld [vmem:[#allocation13 + $0xe0] sm:$0xff] }
 0x1a9   : > { %v5154_v28 = vpack.c.bf16 %v1246_v27, %v1244_v20  ;;  %v1406_v29 = vpop.f32.mrf.mxu1  ;;  %v4240_v20 = vld [vmem:[%s6479_s22 + $0x70] sm:$0xf] }
 0x1aa   : > { %v5314_v30 = vpack.c.bf16 %v1406_v29, %v1404_v22  ;;  %v4890_v27 = vld [vmem:[%s6468_s29 + $0x90] sm:$0xff]  ;;  %v4241_v31 = vor.u32 %v4959_v21, %v4240_v20 }
 0x1ab   : > { %5547 = vst [vmem:[%s6546_s23 + $0x38] sm:$0xff] %v5154_v28   ;;  %v4397_v28 = vor.u32 %v4996_v17, %v4394_v18 }
 0x1ac   : > { %5579 = vst [vmem:[%s6546_s23 + $0x138] sm:$0xff] %v5314_v30   ;;  %2764 = vmatpush.bf16.msrb.mxu3 %v5024_v48 }
 0x1ae   : > { %v1501_v37 = vpop.f32.mrf.mxu3 }
 0x1af   : > { %v5409_v40 = vpack.c.bf16 %v1501_v37, %v1499_v25  ;;  %v4250_v25 = vld [vmem:[%s6479_s22 + $0x88] sm:$0xf0] }
 0x1b0   : > { %v1249_v44 = vpop.f32.mrf.mxu0  ;;  %v1461_v19 = vpop.f32.mrf.mxu2  ;;  %v4253_v29 = vor.u32 %v4960_v24, %v4250_v25 }
 0x1b1   : > { %5598 = vst [vmem:[%s6546_s23 + $0x1d0] sm:$0xff] %v5409_v40   ;;  %v1409_v46 = vpop.f32.mrf.mxu1  ;;  %v5369_v22 = vpack.c.bf16 %v1461_v19, %v1459_v10  ;;  %v5038_v10 = vld [vmem:[#allocation13 + $0xf0] sm:$0xff] }
 0x1b3   : > { %1288 = vmatmul.bf16.gmra.mxu0 %v4888_v41  ;;  %2722 = vmatmul.bf16.gmra.mxu3 %v4425_v42  ;;  %5590 = vst [vmem:[%s6546_s23 + $0x190] sm:$0xff] %v5369_v22   ;;  %v5059_v41 = vld [vmem:[#allocation14 + $0x58] sm:$0xff]  ;;  %v5000_v42 = vld [vmem:[%s6489_s15 + $0x44] sm:$0xf]  ;;  %v5037_v22 = vld [vmem:[#allocation13 + $0xe8] sm:$0xff] }
 0x1b4   : > { %2138 = vmatmul.bf16.gmra.mxu1 %v4225_v45  ;;  %v4248_v45 = vld [vmem:[%s6479_s22 + $0x80] sm:$0xf]  ;;  %3409 = vmatpush.bf16.msra.mxu2 %v5059_v41 }
 0x1b5   : > { %2242 = vmatmul.bf16.gmra.mxu2 %v4253_v29  ;;  %v4384_v29 = vld [vmem:[%s6489_s15 + $0x8] sm:$0xf] }
 0x1b6   : > { %v1504_v49 = vpop.f32.mrf.mxu3 }
 0x1b8   : > { %v1251_v51 = vpop.f32.mrf.mxu0  ;;  %v2203_v34 = vpop.f32.mrf.mxu2 }
 0x1b9   : > { %v5159_v52 = vpack.c.bf16 %v1251_v51, %v1249_v44  ;;  %v1411_v53 = vpop.f32.mrf.mxu1 }
 0x1ba   : > { %v5319_v54 = vpack.c.bf16 %v1411_v53, %v1409_v46  ;;  %v4961_v46 = vld [vmem:[%s6479_s22 + $0x84] sm:$0xf0]  ;;  %v4413_v53 = vor.u32 %v5000_v42, %v4410_v43  ;;  %v4274_v42 = vld [vmem:[%s6479_s22 + $0xb8] sm:$0xf0] }
 0x1bb   : > { %5548 = vst [vmem:[%s6546_s23 + $0x40] sm:$0xff] %v5159_v52   ;;  %v4891_v52 = vld [vmem:[%s6468_s29 + $0x98] sm:$0xff]  ;;  %v4249_v56 = vor.u32 %v4961_v46, %v4248_v45 }
 0x1bc   : > { %5580 = vst [vmem:[%s6546_s23 + $0x140] sm:$0xff] %v5319_v54  }
 0x1be   : > { %v1506_v62 = vpop.f32.mrf.mxu3 }
 0x1bf   : > { %v5414_v1 = vpack.c.bf16 %v1506_v62, %v1504_v49  ;;  %v4962_v49 = vld [vmem:[%s6479_s22 + $0x94] sm:$0xf] }
 0x1c0   : > { %v1254_v5 = vpop.f32.mrf.mxu0  ;;  %v2205_v44 = vpop.f32.mrf.mxu2  ;;  %v4261_v54 = vor.u32 %v4962_v49, %v4258_v50  ;;  %v5035_v49 = vld [vmem:[#allocation13 + $0xd8] sm:$0xff] }
 0x1c1   : > { %5599 = vst [vmem:[%s6546_s23 + $0x1d8] sm:$0xff] %v5414_v1   ;;  %v1414_v7 = vpop.f32.mrf.mxu1 }
 0x1c3   : > { %1293 = vmatmul.bf16.gmra.mxu0 %v4889_v2  ;;  %2736 = vmatmul.bf16.vlgmr.msra.gmra.mxu3 %v4381_v3  ;;  %v5004_v3 = vld [vmem:[%s6489_s15 + $0x64] sm:$0xf] }
 0x1c4   : > { %2143 = vmatmul.bf16.gmra.mxu1 %v4233_v6  ;;  %2786 = vmatpush.bf16.msra.mxu3 %v5039_v61 }
 0x1c5   : > { %2247 = vmatmul.bf16.gmra.mxu2 %v4261_v54 }
 0x1c6   : > { %v1509_v11 = vpop.f32.mrf.mxu3 }
 0x1c8   : > { %v1256_v13 = vpop.f32.mrf.mxu0  ;;  %v2208_v59 = vpop.f32.mrf.mxu2  ;;  %2787 = vmatpush.bf16.msra.mxu3 %v5038_v10 }
 0x1c9   : > { %v5164_v14 = vpack.c.bf16 %v1256_v13, %v1254_v5  ;;  %v1416_v15 = vpop.f32.mrf.mxu1 }
 0x1ca   : > { %v5324_v16 = vpack.c.bf16 %v1416_v15, %v1414_v7  ;;  %v4256_v7 = vld [vmem:[%s6479_s22 + $0x90] sm:$0xf]  ;;  %v4429_v15 = vor.u32 %v5004_v3, %v4426_v4 }
 0x1cb   : > { %5549 = vst [vmem:[%s6546_s23 + $0x48] sm:$0xff] %v5164_v14   ;;  %v4892_v14 = vld [vmem:[%s6468_s29 + $0xa0] sm:$0xff]  ;;  %v4257_v18 = vor.u32 %v4963_v8, %v4256_v7 }
 0x1cc   : > { %5581 = vst [vmem:[%s6546_s23 + $0x148] sm:$0xff] %v5324_v16   ;;  %2788 = vmatpush.bf16.msra.mxu3 %v5037_v22 }
 0x1ce   : > { %v1511_v23 = vpop.f32.mrf.mxu3 }
 0x1cf   : > { %v5419_v26 = vpack.c.bf16 %v1511_v23, %v1509_v11  ;;  %v4964_v11 = vld [vmem:[%s6479_s22 + $0xa4] sm:$0xf] }
 0x1d0   : > { %v1259_v30 = vpop.f32.mrf.mxu0  ;;  %v2210_v6 = vpop.f32.mrf.mxu2  ;;  %v4269_v16 = vor.u32 %v4964_v11, %v4266_v12  ;;  %2789 = vmatpush.bf16.msra.mxu3 %v5036_v36 }
 0x1d1   : > { %5600 = vst [vmem:[%s6546_s23 + $0x1e0] sm:$0xff] %v5419_v26   ;;  %v1419_v32 = vpop.f32.mrf.mxu1 }
 0x1d3   : > { %1298 = vmatmul.bf16.gmra.mxu0 %v4890_v27  ;;  %2741 = vmatmul.bf16.gmra.mxu3 %v4397_v28  ;;  %v5058_v28 = vld [vmem:[#allocation14 + $0x50] sm:$0xff] }
 0x1d4   : > { %2148 = vmatmul.bf16.gmra.mxu1 %v4241_v31  ;;  %3410 = vmatpush.bf16.msra.mxu2 %v5058_v28  ;;  %v4290_v28 = vld [vmem:[%s6479_s22 + $0xd8] sm:$0xf0] }
 0x1d5   : > { %2252 = vmatmul.bf16.gmra.mxu2 %v4269_v16  ;;  %2790 = vmatpush.bf16.msra.mxu3 %v5035_v49  ;;  %v4416_v16 = vld [vmem:[%s6489_s15 + $0x48] sm:$0xf]  ;;  %v4972_v49 = vld [vmem:[%s6479_s22 + $0xe4] sm:$0xf] }
 0x1d6   : > { %v1514_v35 = vpop.f32.mrf.mxu3 }
 0x1d8   : > { %v1261_v37 = vpop.f32.mrf.mxu0  ;;  %v2213_v20 = vpop.f32.mrf.mxu2 }
 0x1d9   : > { %v5169_v38 = vpack.c.bf16 %v1261_v37, %v1259_v30  ;;  %v1421_v39 = vpop.f32.mrf.mxu1  ;;  %v4995_v30 = vld [vmem:[%s6489_s15 + $0x14] sm:$0xf0]  ;;  %v5050_v37 = vld [vmem:[#allocation14 + $0x10] sm:$0xff] }
 0x1da   : > { %v5329_v40 = vpack.c.bf16 %v1421_v39, %v1419_v32  ;;  %v4385_v41 = vor.u32 %v4995_v30, %v4384_v29  ;;  %3396 = vmatpush.bf16.msra.mxu1 %v5050_v37 }
 0x1db   : > { %5550 = vst [vmem:[%s6546_s23 + $0x50] sm:$0xff] %v5169_v38   ;;  %v4966_v38 = vld [vmem:[%s6479_s22 + $0xb4] sm:$0xf] }
 0x1dc   : > { %5582 = vst [vmem:[%s6546_s23 + $0x150] sm:$0xff] %v5329_v40   ;;  %v4893_v40 = vld [vmem:[%s6468_s29 + $0xa8] sm:$0xff]  ;;  %v4277_v45 = vor.u32 %v4966_v38, %v4274_v42  ;;  %v5007_v42 = vld [vmem:[%s6489_s15 + $0x74] sm:$0xf0] }
 0x1de   : > { %v1516_v47 = vpop.f32.mrf.mxu3 }
 0x1df   : > { %v5424_v51 = vpack.c.bf16 %v1516_v47, %v1514_v35 }
 0x1e0   : > { %v1264_v55 = vpop.f32.mrf.mxu0  ;;  %v2215_v32 = vpop.f32.mrf.mxu2 }
 0x1e1   : > { %5601 = vst [vmem:[%s6546_s23 + $0x1e8] sm:$0xff] %v5424_v51   ;;  %v2114_v57 = vpop.f32.mrf.mxu1 }
 0x1e2   : > { %v2204_v63 = vadd.f32 %v2203_v34, %v2114_v57  ;;  %v4965_v34 = vld [vmem:[%s6479_s22 + $0xa4] sm:$0xf0] }
 0x1e3   : > { %1303 = vmatmul.bf16.gmra.mxu0 %v4891_v52  ;;  %2746 = vmatmul.bf16.gmra.mxu3 %v4413_v53 }
 0x1e4   : > { %2153 = vmatmul.bf16.gmra.mxu1 %v4249_v56  ;;  %v4999_v56 = vld [vmem:[%s6489_s15 + $0x34] sm:$0xf0] }
 0x1e5   : > { %2257 = vmatmul.bf16.gmra.mxu2 %v4277_v45  ;;  %v4288_v45 = vld [vmem:[%s6479_s22 + $0xd0] sm:$0xf] }
 0x1e6   : > { %v1519_v60 = vpop.f32.mrf.mxu3 }
 0x1e8   : > { %v1266_v62 = vpop.f32.mrf.mxu0  ;;  %v2218_v47 = vpop.f32.mrf.mxu2 }
 0x1e9   : > { %v5174_v0 = vpack.c.bf16 %v1266_v62, %v1264_v55  ;;  %v2116_v1 = vpop.f32.mrf.mxu1  ;;  %v4400_v55 = vld [vmem:[%s6489_s15 + $0x28] sm:$0xf]  ;;  %v5034_v62 = vld [vmem:[#allocation13 + $0xd0] sm:$0xff] }
 0x1ea   : > { %v2206_v2 = vadd.f32 %v2205_v44, %v2116_v1  ;;  %v4265_v44 = vor.u32 %v4965_v34, %v4264_v33  ;;  %v4894_v1 = vld [vmem:[%s6468_s29 + $0xb0] sm:$0xff]  ;;  %2791 = vmatpush.bf16.msra.mxu3 %v5034_v62 }
 0x1eb   : > { %5551 = vst [vmem:[%s6546_s23 + $0x58] sm:$0xff] %v5174_v0   ;;  %v4282_v0 = vld [vmem:[%s6479_s22 + $0xc8] sm:$0xf0] }
 0x1ec   : > { %v5439_v5 = vpack.c.bf16 %v2206_v2, %v2204_v63  ;;  %v4968_v63 = vld [vmem:[%s6479_s22 + $0xc4] sm:$0xf]  ;;  %v4401_v2 = vor.u32 %v4999_v56, %v4400_v55 }
 0x1ed   : > { %v4285_v3 = vor.u32 %v4968_v63, %v4282_v0  ;;  %v5069_v63 = vld [vmem:[#allocation14 + $0xa8] sm:$0xff] }
 0x1ee   : > { %v1521_v9 = vpop.f32.mrf.mxu3  ;;  %5440 = vst [vmem:[%s6666_s11] sm:$0xff] %v5439_v5  }
 0x1ef   : > { %v5429_v13 = vpack.c.bf16 %v1521_v9, %v1519_v60  ;;  %v4967_v60 = vld [vmem:[%s6479_s22 + $0xb4] sm:$0xf0]  ;;  %v5033_v9 = vld [vmem:[#allocation13 + $0xc8] sm:$0xff] }
 0x1f0   : > { %v1269_v17 = vpop.f32.mrf.mxu0  ;;  %v2220_v58 = vpop.f32.mrf.mxu2  ;;  %2792 = vmatpush.bf16.msra.mxu3 %v5033_v9  ;;  %v4993_v9 = vld [vmem:[%s6489_s15 + $0xc] sm:$0xf] }
 0x1f1   : > { %5602 = vst [vmem:[%s6546_s23 + $0x1f0] sm:$0xff] %v5429_v13   ;;  %v2119_v19 = vpop.f32.mrf.mxu1 }
 0x1f2   : > { %v2209_v24 = vadd.f32 %v2208_v59, %v2119_v19  ;;  %v4272_v59 = vld [vmem:[%s6479_s22 + $0xb0] sm:$0xf] }
 0x1f3   : > { %1308 = vmatmul.bf16.gmra.mxu0 %v4892_v14  ;;  %2751 = vmatmul.bf16.gmra.mxu3 %v4429_v15  ;;  %v4273_v5 = vor.u32 %v4967_v60, %v4272_v59  ;;  %v5057_v15 = vld [vmem:[#allocation14 + $0x48] sm:$0xff]  ;;  %v5056_v59 = vld [vmem:[#allocation14 + $0x40] sm:$0xff]  ;;  %v5087_v60 = vld [vmem:[#allocation14 + $0x138] sm:$0xff] }
 0x1f4   : > { %2158 = vmatmul.bf16.gmra.mxu1 %v4257_v18  ;;  %3411 = vmatpush.bf16.msra.mxu2 %v5057_v15  ;;  %v5078_v15 = vld [vmem:[#allocation14 + $0xf0] sm:$0xff] }
 0x1f5   : > { %2262 = vmatmul.bf16.gmra.mxu2 %v4285_v3 }
 0x1f6   : > { %v1524_v21 = vpop.f32.mrf.mxu3 }
 0x1f8   : > { %v1271_v23 = vpop.f32.mrf.mxu0  ;;  %v2223_v7 = vpop.f32.mrf.mxu2  ;;  %3412 = vmatpush.bf16.msra.mxu2 %v5056_v59  ;;  %v4898_v59 = vld [vmem:[%s6468_s29 + $0xd0] sm:$0xff] }
 0x1f9   : > { %v5179_v25 = vpack.c.bf16 %v1271_v23, %v1269_v17  ;;  %v2121_v26 = vpop.f32.mrf.mxu1  ;;  %v5003_v17 = vld [vmem:[%s6489_s15 + $0x54] sm:$0xf0]  ;;  %v5032_v23 = vld [vmem:[#allocation13 + $0xc0] sm:$0xff] }
 0x1fa   : > { %v2211_v27 = vadd.f32 %v2210_v6, %v2121_v26  ;;  %v4895_v26 = vld [vmem:[%s6468_s29 + $0xb8] sm:$0xff]  ;;  %2793 = vmatpush.bf16.msra.mxu3 %v5032_v23  ;;  %v5068_v23 = vld [vmem:[#allocation14 + $0xa0] sm:$0xff] }
 0x1fb   : > { %5552 = vst [vmem:[%s6546_s23 + $0x60] sm:$0xff] %v5179_v25   ;;  %v4970_v25 = vld [vmem:[%s6479_s22 + $0xd4] sm:$0xf] }
 0x1fc   : > { %v5444_v31 = vpack.c.bf16 %v2211_v27, %v2209_v24  ;;  %v5049_v24 = vld [vmem:[#allocation14 + $0x8] sm:$0xff]  ;;  %v4417_v27 = vor.u32 %v5003_v17, %v4416_v16  ;;  %3447 = vmatpush.bf16.msrb.mxu2 %v5087_v60 }
 0x1fd   : > { %3397 = vmatpush.bf16.msra.mxu1 %v5049_v24  ;;  %v5085_v16 = vld [vmem:[#allocation14 + $0x128] sm:$0xff] }
 0x1fe   : > { %v1526_v35 = vpop.f32.mrf.mxu3  ;;  %5604 = vst [vmem:[%s6666_s11 + $0x8] sm:$0xff] %v5444_v31   ;;  %v4293_v31 = vor.u32 %v4970_v25, %v4290_v28  ;;  %v5077_v28 = vld [vmem:[#allocation14 + $0xe8] sm:$0xff] }
 0x1ff   : > { %v5434_v39 = vpack.c.bf16 %v1526_v35, %v1524_v21  ;;  %v4969_v21 = vld [vmem:[%s6479_s22 + $0xc4] sm:$0xf0]  ;;  %v5071_v35 = vld [vmem:[#allocation14 + $0xb8] sm:$0xff] }
 0x200   : > { %v1274_v43 = vpop.f32.mrf.mxu0  ;;  %v2225_v19 = vpop.f32.mrf.mxu2 }
 0x201   : > { %5603 = vst [vmem:[%s6546_s23 + $0x1f8] sm:$0xff] %v5434_v39   ;;  %v2124_v46 = vpop.f32.mrf.mxu1 }
 0x202   : > { %v2214_v51 = vadd.f32 %v2213_v20, %v2124_v46  ;;  %v4280_v20 = vld [vmem:[%s6479_s22 + $0xc0] sm:$0xf]  ;;  %v4971_v46 = vld [vmem:[%s6479_s22 + $0xd4] sm:$0xf0] }
 0x203   : > { %1313 = vmatmul.bf16.gmra.mxu0 %v4893_v40  ;;  %2765 = vmatmul.bf16.vlgmr.msrb.gmra.mxu3 %v4385_v41  ;;  %v4281_v30 = vor.u32 %v4969_v21, %v4280_v20  ;;  %v4432_v41 = vld [vmem:[%s6489_s15 + $0x68] sm:$0xf]  ;;  %v4289_v56 = vor.u32 %v4971_v46, %v4288_v45  ;;  %v4997_v45 = vld [vmem:[%s6489_s15 + $0x2c] sm:$0xf] }
 0x204   : > { %2163 = vmatmul.bf16.gmra.mxu1 %v4265_v44  ;;  %3419 = vmatpush.bf16.msrb.mxu3 %v5071_v35  ;;  %v4897_v20 = vld [vmem:[%s6468_s29 + $0xc8] sm:$0xff] }
 0x205   : > { %2267 = vmatmul.bf16.gmra.mxu2 %v4293_v31  ;;  %v5067_v31 = vld [vmem:[#allocation14 + $0x98] sm:$0xff] }
 0x206   : > { %v6683_v48 = vpop.f32.mrf.mxu3 }
 0x208   : > { %v1276_v50 = vpop.f32.mrf.mxu0  ;;  %v2228_v33 = vpop.f32.mrf.mxu2 }
 0x209   : > { %v5184_v52 = vpack.c.bf16 %v1276_v50, %v1274_v43  ;;  %v2126_v53 = vpop.f32.mrf.mxu1  ;;  %v4298_v50 = vld [vmem:[%s6479_s22 + $0xe8] sm:$0xf0] }
 0x20a   : > { %v2216_v54 = vadd.f32 %v2215_v32, %v2126_v53  ;;  %v5070_v53 = vld [vmem:[#allocation14 + $0xb0] sm:$0xff] }
 0x20b   : > { %5553 = vst [vmem:[%s6546_s23 + $0x68] sm:$0xff] %v5184_v52   ;;  %v4433_v52 = vor.u32 %v5007_v42, %v4432_v41  ;;  %3420 = vmatpush.bf16.msrb.mxu3 %v5070_v53  ;;  %v5066_v41 = vld [vmem:[#allocation14 + $0x90] sm:$0xff]  ;;  %v5075_v42 = vld [vmem:[#allocation14 + $0xd8] sm:$0xff] }
 0x20c   : > { %v5449_v57 = vpack.c.bf16 %v2216_v54, %v2214_v51  ;;  %v4896_v51 = vld [vmem:[%s6468_s29 + $0xc0] sm:$0xff]  ;;  %v4301_v54 = vor.u32 %v4972_v49, %v4298_v50  ;;  %v4304_v49 = vld [vmem:[%s6479_s22 + $0xf0] sm:$0xf]  ;;  %v4975_v50 = vld [vmem:[%s6479_s22 + $0xf4] sm:$0xf0] }
 0x20d   : > { %v5074_v53 = vld [vmem:[#allocation14 + $0xd0] sm:$0xff] }
 0x20e   : > { %v6690_v61 = vpop.f32.mrf.mxu3  ;;  %5605 = vst [vmem:[%s6666_s11 + $0x10] sm:$0xff] %v5449_v57  }
 0x20f   : > { %3421 = vmatpush.bf16.msrb.mxu3 %v5069_v63 }
 0x210   : > { %v1279_v4 = vpop.f32.mrf.mxu0  ;;  %v2230_v44 = vpop.f32.mrf.mxu2 }
 0x211   : > { %v2129_v6 = vpop.f32.mrf.mxu1 }
 0x212   : > { %v2219_v11 = vadd.f32 %v2218_v47, %v2129_v6  ;;  %v5086_v6 = vld [vmem:[#allocation14 + $0x130] sm:$0xff] }
 0x213   : > { %1318 = vmatmul.bf16.gmra.mxu0 %v4894_v1  ;;  %2770 = vmatmul.bf16.gmra.mxu3 %v4401_v2  ;;  %v5048_v2 = vld [vmem:[#allocation14] sm:$0xff] }
 0x214   : > { %2168 = vmatmul.bf16.gmra.mxu1 %v4273_v5  ;;  %v5079_v5 = vld [vmem:[#allocation14 + $0xf8] sm:$0xff]  ;;  %3448 = vmatpush.bf16.msrb.mxu2 %v5086_v6 }
 0x215   : > { %2272 = vmatmul.bf16.gmra.mxu2 %v4301_v54  ;;  %3398 = vmatpush.bf16.msra.mxu1 %v5048_v2  ;;  %v5081_v54 = vld [vmem:[#allocation14 + $0x108] sm:$0xff]  ;;  %v5095_v6 = vld [vmem:[#allocation14 + $0x178] sm:$0xff] }
 0x216   : > { %v6696_v8 = vpop.f32.mrf.mxu3  ;;  %3422 = vmatpush.bf16.msrb.mxu3 %v5068_v23  ;;  %v5001_v23 = vld [vmem:[%s6489_s15 + $0x4c] sm:$0xf] }
 0x218   : > { %v1281_v10 = vpop.f32.mrf.mxu0  ;;  %3449 = vmatpush.bf16.msrb.mxu2 %v5085_v16 }
 0x219   : > { %v5189_v12 = vpack.c.bf16 %v1281_v10, %v1279_v4  ;;  %v2131_v13 = vpop.f32.mrf.mxu1  ;;  %3433 = vmatpush.bf16.msrb.mxu1 %v5079_v5  ;;  %v4386_v10 = vld [vmem:[%s6489_s15 + $0x18] sm:$0xf0]  ;;  %v5080_v5 = vld [vmem:[#allocation14 + $0x100] sm:$0xff] }
 0x21a   : > { %v2221_v14 = vadd.f32 %v2220_v58, %v2131_v13  ;;  %v2233_v58 = vpop.f32.mrf.mxu2  ;;  %v4389_v21 = vor.u32 %v4993_v9, %v4386_v10  ;;  %3423 = vmatpush.bf16.msrb.mxu3 %v5067_v31  ;;  %v5072_v9 = vld [vmem:[#allocation14 + $0xc0] sm:$0xff] }
 0x21b   : > { %5554 = vst [vmem:[%s6546_s23 + $0x70] sm:$0xff] %v5189_v12   ;;  %v4296_v12 = vld [vmem:[%s6479_s22 + $0xe0] sm:$0xf] }
 0x21c   : > { %v5454_v18 = vpack.c.bf16 %v2221_v14, %v2219_v11  ;;  %v4973_v14 = vld [vmem:[%s6479_s22 + $0xe4] sm:$0xf0] }
 0x21d   : > { %3434 = vmatpush.bf16.msrb.mxu1 %v5078_v15 }
 0x21e   : > { %v6703_v22 = vpop.f32.mrf.mxu3  ;;  %5606 = vst [vmem:[%s6666_s11 + $0x18] sm:$0xff] %v5454_v18   ;;  %v4974_v18 = vld [vmem:[%s6479_s22 + $0xf4] sm:$0xf]  ;;  %3424 = vmatpush.bf16.msrb.mxu3 %v5066_v41  ;;  %v5046_v41 = vld [vmem:[%s6492_s6 + $0x2c] sm:$0xf0] }
 0x220   : > { %v1284_v29 = vpop.f32.mrf.mxu0 }
 0x221   : > { %v2134_v32 = vpop.f32.mrf.mxu1  ;;  %3435 = vmatpush.bf16.msrb.mxu1 %v5077_v28 }
 0x222   : > { %v2224_v37 = vadd.f32 %v2223_v7, %v2134_v32  ;;  %v2235_v13 = vpop.f32.mrf.mxu2  ;;  %v5076_v32 = vld [vmem:[#allocation14 + $0xe0] sm:$0xff] }
 0x223   : > { %1323 = vmatmul.bf16.gmra.mxu0 %v4895_v26  ;;  %2775 = vmatmul.bf16.gmra.mxu3 %v4417_v27  ;;  %v4297_v26 = vor.u32 %v4973_v14, %v4296_v12  ;;  %v5110_v12 = vld [vmem:[#allocation14 + $0x1f0] sm:$0xff] }
 0x224   : > { %2173 = vmatmul.bf16.gmra.mxu1 %v4281_v30 }
 0x225   : > { %3436 = vmatpush.bf16.msrb.mxu1 %v5076_v32  ;;  %v4899_v32 = vld [vmem:[%s6468_s29 + $0xd8] sm:$0xff] }
 0x226   : > { %v6709_v34 = vpop.f32.mrf.mxu3 }
 0x228   : > { %v1286_v36 = vpop.f32.mrf.mxu0 }
 0x229   : > { %v5194_v38 = vpack.c.bf16 %v1286_v36, %v1284_v29  ;;  %v2136_v39 = vpop.f32.mrf.mxu1  ;;  %v5084_v29 = vld [vmem:[#allocation14 + $0x120] sm:$0xff]  ;;  %3437 = vmatpush.bf16.msrb.mxu1 %v5075_v42 }
 0x22a   : > { %v2226_v40 = vadd.f32 %v2225_v19, %v2136_v39  ;;  %v4306_v19 = vld [vmem:[%s6479_s22 + $0xf8] sm:$0xf0]  ;;  %3450 = vmatpush.bf16.msrb.mxu2 %v5084_v29  ;;  %v6735_v30 = vpop.f32.mrf.mxu2  ;;  %v5092_v29 = vld [vmem:[#allocation14 + $0x160] sm:$0xff] }
 0x22b   : > { %5555 = vst [vmem:[%s6546_s23 + $0x78] sm:$0xff] %v5194_v38   ;;  %v4309_v24 = vor.u32 %v4974_v18, %v4306_v19 }
 0x22c   : > { %v5459_v43 = vpack.c.bf16 %v2226_v40, %v2224_v37 }
 0x22d   : > { %2277 = vmatmul.bf16.gmra.mxu2 %v4309_v24  ;;  %3438 = vmatpush.bf16.msrb.mxu1 %v5074_v53  ;;  %v4418_v24 = vld [vmem:[%s6489_s15 + $0x58] sm:$0xf0] }
 0x22e   : > { %v6716_v47 = vpop.f32.mrf.mxu3  ;;  %5607 = vst [vmem:[%s6666_s11 + $0x20] sm:$0xff] %v5459_v43   ;;  %v5082_v43 = vld [vmem:[#allocation14 + $0x110] sm:$0xff] }
 0x230   : > { %v1289_v55 = vpop.f32.mrf.mxu0 }
 0x231   : > { %v2139_v57 = vpop.f32.mrf.mxu1 }
 0x232   : > { %v2229_v1 = vadd.f32 %v2228_v33, %v2139_v57  ;;  %v5083_v33 = vld [vmem:[#allocation14 + $0x118] sm:$0xff]  ;;  %v4570_v57 = vld [vmem:[%s6492_s6 + $0x20] sm:$0xf0] }
 0x233   : > { %1328 = vmatmul.bf16.gmra.mxu0 %v4896_v51  ;;  %2780 = vmatmul.bf16.gmra.mxu3 %v4433_v52  ;;  %v2240_v51 = vpop.f32.mrf.mxu2  ;;  %v5065_v52 = vld [vmem:[#allocation14 + $0x88] sm:$0xff] }
 0x234   : > { %2178 = vmatmul.bf16.gmra.mxu1 %v4289_v56  ;;  %3451 = vmatpush.bf16.msrb.mxu2 %v5083_v33  ;;  %v5040_v56 = vld [vmem:[%s6492_s6 + $0x4] sm:$0xf]  ;;  %v4421_v33 = vor.u32 %v5001_v23, %v4418_v24 }
 0x235   : > { %3425 = vmatpush.bf16.msrb.mxu3 %v5065_v52  ;;  %v4573_v63 = vor.u32 %v5040_v56, %v4570_v57  ;;  %v5089_v57 = vld [vmem:[#allocation14 + $0x148] sm:$0xff] }
 0x236   : > { %v6722_v62 = vpop.f32.mrf.mxu3 }
 0x238   : > { %v1291_v0 = vpop.f32.mrf.mxu0  ;;  %3452 = vmatpush.bf16.msrb.mxu2 %v5082_v43  ;;  %v5091_v43 = vld [vmem:[#allocation14 + $0x158] sm:$0xff] }
 0x239   : > { %v5199_v3 = vpack.c.bf16 %v1291_v0, %v1289_v55  ;;  %v2141_v4 = vpop.f32.mrf.mxu1 }
 0x23a   : > { %v2231_v7 = vadd.f32 %v2230_v44, %v2141_v4  ;;  %v5073_v4 = vld [vmem:[#allocation14 + $0xc8] sm:$0xff] }
 0x23b   : > { %5556 = vst [vmem:[%s6546_s23 + $0x80] sm:$0xff] %v5199_v3   ;;  %v5064_v3 = vld [vmem:[#allocation14 + $0x80] sm:$0xff]  ;;  %3439 = vmatpush.bf16.msrb.mxu1 %v5073_v4 }
 0x23c   : > { %v5464_v11 = vpack.c.bf16 %v2231_v7, %v2229_v1  ;;  %v4305_v1 = vor.u32 %v4975_v50, %v4304_v49  ;;  %3453 = vmatpush.bf16.msrb.mxu2 %v5081_v54  ;;  %v5111_v7 = vld [vmem:[#allocation14 + $0x1f8] sm:$0xff]  ;;  %3426 = vmatpush.bf16.msrb.mxu3 %v5064_v3  ;;  %v5106_v49 = vld [vmem:[#allocation14 + $0x1d0] sm:$0xff]  ;;  %v4578_v3 = vld [vmem:[%s6492_s6 + $0x28] sm:$0xf0] }
 0x23d   : > { %3413 = vmatmul.bf16.vlgmr.msra.gmra.mxu2 %v4573_v63  ;;  %v4434_v63 = vld [vmem:[%s6489_s15 + $0x78] sm:$0xf0] }
 0x23e   : > { %v6729_v17 = vpop.f32.mrf.mxu3  ;;  %5608 = vst [vmem:[%s6666_s11 + $0x28] sm:$0xff] %v5464_v11   ;;  %v5094_v11 = vld [vmem:[#allocation14 + $0x170] sm:$0xff] }
 0x23f   : > { %3440 = vmatpush.bf16.msrb.mxu1 %v5072_v9 }
 0x240   : > { %v1294_v25 = vpop.f32.mrf.mxu0  ;;  %3454 = vmatpush.bf16.msrb.mxu2 %v5080_v5  ;;  %v5088_v5 = vld [vmem:[#allocation14 + $0x140] sm:$0xff] }
 0x241   : > { %v2144_v27 = vpop.f32.mrf.mxu1 }
 0x242   : > { %v2234_v38 = vadd.f32 %v2233_v58, %v2144_v27  ;;  %v5044_v27 = vld [vmem:[%s6492_s6 + $0x1c] sm:$0xf0] }
 0x243   : > { %1333 = vmatmul.bf16.gmra.mxu0 %v4897_v20  ;;  %2794 = vmatmul.bf16.vlgmr.msra.gmra.mxu3 %v4389_v21  ;;  %v5093_v20 = vld [vmem:[#allocation14 + $0x168] sm:$0xff] }
 0x244   : > { %2183 = vmatmul.bf16.gmra.mxu1 %v4297_v26  ;;  %3461 = vmatpush.bf16.msra.mxu3 %v5095_v6  ;;  %v5109_v21 = vld [vmem:[#allocation14 + $0x1e8] sm:$0xff]  ;;  %v4568_v26 = vld [vmem:[%s6492_s6] sm:$0xf] }
 0x245   : > { %3489 = vmatpush.bf16.msra.mxu2 %v5111_v7  ;;  %v5104_v6 = vld [vmem:[#allocation14 + $0x1c0] sm:$0xff] }
 0x246   : > { %v2737_v35 = vpop.f32.mrf.mxu3 }
 0x247   : > { %v6738_v36 = vadd.f32 %v2737_v35, %v6683_v48  ;;  %v4402_v48 = vld [vmem:[%s6489_s15 + $0x38] sm:$0xf0] }
 0x248   : > { %v1296_v37 = vpop.f32.mrf.mxu0  ;;  %v4405_v60 = vor.u32 %v4997_v45, %v4402_v48  ;;  %3462 = vmatpush.bf16.msra.mxu3 %v5094_v11 }
 0x249   : > { %v5204_v39 = vpack.c.bf16 %v1296_v37, %v1294_v25  ;;  %v2146_v40 = vpop.f32.mrf.mxu1  ;;  %3490 = vmatpush.bf16.msra.mxu2 %v5110_v12  ;;  %v4569_v37 = vor.u32 %v5044_v27, %v4568_v26  ;;  %v5097_v26 = vld [vmem:[#allocation14 + $0x188] sm:$0xff] }
 0x24a   : > { %v2236_v44 = vadd.f32 %v2235_v13, %v2146_v40  ;;  %v4584_v40 = vld [vmem:[%s6492_s6 + $0x10] sm:$0xf] }
 0x24b   : > { %5557 = vst [vmem:[%s6546_s23 + $0x88] sm:$0xff] %v5204_v39   ;;  %v5103_v39 = vld [vmem:[#allocation14 + $0x1b8] sm:$0xff]  ;;  %v4585_v42 = vor.u32 %v5046_v41, %v4584_v40 }
 0x24c   : > { %v5469_v46 = vpack.c.bf16 %v2236_v44, %v2234_v38  ;;  %3463 = vmatpush.bf16.msra.mxu3 %v5093_v20  ;;  %v5107_v44 = vld [vmem:[#allocation14 + $0x1d8] sm:$0xff] }
 0x24d   : > { %3491 = vmatpush.bf16.msra.mxu2 %v5109_v21 }
 0x24e   : > { %v2739_v55 = vpop.f32.mrf.mxu3  ;;  %5609 = vst [vmem:[%s6666_s11 + $0x30] sm:$0xff] %v5469_v46   ;;  %3455 = vmatmul.bf16.vlgmr.msrb.gmra.mxu2 %v4585_v42  ;;  %v5090_v46 = vld [vmem:[#allocation14 + $0x150] sm:$0xff] }
 0x24f   : > { %v6749_v58 = vadd.f32 %v2739_v55, %v6690_v61  ;;  %v2243_v61 = vpop.f32.mrf.mxu2  ;;  %v5101_v55 = vld [vmem:[#allocation14 + $0x1a8] sm:$0xff] }
 0x250   : > { %v1299_v0 = vpop.f32.mrf.mxu0  ;;  %3464 = vmatpush.bf16.msra.mxu3 %v5092_v29  ;;  %v5045_v29 = vld [vmem:[%s6492_s6 + $0x24] sm:$0xf0] }
 0x251   : > { %v2149_v2 = vpop.f32.mrf.mxu1 }
 0x252   : > { %v2239_v15 = vadd.f32 %v6735_v30, %v2149_v2  ;;  %v5108_v30 = vld [vmem:[#allocation14 + $0x1e0] sm:$0xff]  ;;  %v5041_v2 = vld [vmem:[%s6492_s6 + $0xc] sm:$0xf] }
 0x253   : > { %1338 = vmatmul.bf16.gmra.mxu0 %v4898_v59  ;;  %2799 = vmatmul.bf16.gmra.mxu3 %v4405_v60  ;;  %v5105_v59 = vld [vmem:[#allocation14 + $0x1c8] sm:$0xff]  ;;  %v4581_v11 = vor.u32 %v5041_v2, %v4578_v3 }
 0x254   : > { %2188 = vmatmul.bf16.gmra.mxu1 %v4305_v1  ;;  %3492 = vmatpush.bf16.msra.mxu2 %v5108_v30  ;;  %v5005_v60 = vld [vmem:[%s6489_s15 + $0x6c] sm:$0xf]  ;;  %v5100_v1 = vld [vmem:[#allocation14 + $0x1a0] sm:$0xff] }
 0x255   : > { %3465 = vmatpush.bf16.msra.mxu3 %v5091_v43  ;;  %v4437_v9 = vor.u32 %v5005_v60, %v4434_v63 }
 0x256   : > { %v2742_v10 = vpop.f32.mrf.mxu3 }
 0x257   : > { %v6753_v13 = vadd.f32 %v2742_v10, %v6696_v8  ;;  %v2245_v25 = vpop.f32.mrf.mxu2 }
 0x258   : > { %v1301_v14 = vpop.f32.mrf.mxu0  ;;  %3493 = vmatpush.bf16.msra.mxu2 %v5107_v44 }
 0x259   : > { %v5209_v16 = vpack.c.bf16 %v1301_v14, %v1299_v0  ;;  %v2151_v18 = vpop.f32.mrf.mxu1  ;;  %3466 = vmatpush.bf16.msra.mxu3 %v5090_v46  ;;  %v5099_v14 = vld [vmem:[#allocation14 + $0x198] sm:$0xff] }
 0x25a   : > { %v2241_v19 = vadd.f32 %v2240_v51, %v2151_v18 }
 0x25b   : > { %5558 = vst [vmem:[%s6546_s23 + $0x90] sm:$0xff] %v5209_v16   ;;  %v4594_v16 = vld [vmem:[%s6492_s6 + $0x38] sm:$0xf0] }
 0x25c   : > { %v5474_v8 = vpack.c.bf16 %v2241_v19, %v2239_v15  ;;  %3494 = vmatpush.bf16.msra.mxu2 %v5106_v49  ;;  %v5043_v15 = vld [vmem:[%s6492_s6 + $0x1c] sm:$0xf]  ;;  %v5098_v19 = vld [vmem:[#allocation14 + $0x190] sm:$0xff] }
 0x25d   : > { %3467 = vmatpush.bf16.msra.mxu3 %v5089_v57  ;;  %v4597_v18 = vor.u32 %v5043_v15, %v4594_v16  ;;  %v4902_v57 = vld [vmem:[%s6468_s29 + $0xf0] sm:$0xff] }
 0x25e   : > { %v2744_v28 = vpop.f32.mrf.mxu3  ;;  %5610 = vst [vmem:[%s6666_s11 + $0x38] sm:$0xff] %v5474_v8  }
 0x25f   : > { %v6763_v31 = vadd.f32 %v2744_v28, %v6703_v22  ;;  %v2248_v45 = vpop.f32.mrf.mxu2  ;;  %v5102_v22 = vld [vmem:[#allocation14 + $0x1b0] sm:$0xff]  ;;  %v4576_v28 = vld [vmem:[%s6492_s6 + $0x8] sm:$0xf] }
 0x260   : > { %v1304_v35 = vpop.f32.mrf.mxu0  ;;  %3495 = vmatpush.bf16.msra.mxu2 %v5105_v59  ;;  %v4577_v40 = vor.u32 %v5045_v29, %v4576_v28 }
 0x261   : > { %v2154_v38 = vpop.f32.mrf.mxu1  ;;  %3468 = vmatpush.bf16.msra.mxu3 %v5088_v5 }
 0x262   : > { %v2244_v52 = vadd.f32 %v2243_v61, %v2154_v38  ;;  %v4900_v61 = vld [vmem:[%s6468_s29 + $0xe0] sm:$0xff] }
 0x263   : > { %1343 = vmatmul.bf16.gmra.mxu0 %v4899_v32  ;;  %2804 = vmatmul.bf16.gmra.mxu3 %v4421_v33  ;;  %v5096_v33 = vld [vmem:[#allocation14 + $0x180] sm:$0xff] }
 0x264   : > { %3399 = vmatmul.bf16.vlgmr.msra.gmra.mxu1 %v4569_v37  ;;  %3496 = vmatpush.bf16.msra.mxu2 %v5104_v6 }
 0x265   : > { %3475 = vmatpush.bf16.msra.mxu1 %v5103_v39  ;;  %v4901_v39 = vld [vmem:[%s6468_s29 + $0xe8] sm:$0xff] }
 0x266   : > { %v2747_v48 = vpop.f32.mrf.mxu3 }
 0x267   : > { %v6769_v50 = vadd.f32 %v2747_v48, %v6709_v34  ;;  %v2250_v0 = vpop.f32.mrf.mxu2  ;;  %3497 = vmatmul.bf16.vlgmr.msra.gmra.mxu2 %v4597_v18 }
 0x268   : > { %v1306_v51 = vpop.f32.mrf.mxu0 }
 0x269   : > { %v5214_v53 = vpack.c.bf16 %v1306_v51, %v1304_v35  ;;  %v2156_v54 = vpop.f32.mrf.mxu1  ;;  %3476 = vmatpush.bf16.msra.mxu1 %v5102_v22  ;;  %v4592_v35 = vld [vmem:[%s6492_s6 + $0x18] sm:$0xf] }
 0x26a   : > { %v2246_v56 = vadd.f32 %v2245_v25, %v2156_v54 }
 0x26b   : > { %5559 = vst [vmem:[%s6546_s23 + $0x98] sm:$0xff] %v5214_v53   ;;  %v4586_v53 = vld [vmem:[%s6492_s6 + $0x30] sm:$0xf0] }
 0x26c   : > { %v5479_v34 = vpack.c.bf16 %v2246_v56, %v2244_v52  ;;  %v5042_v52 = vld [vmem:[%s6492_s6 + $0x14] sm:$0xf] }
 0x26d   : > { %3477 = vmatpush.bf16.msra.mxu1 %v5101_v55  ;;  %v4589_v59 = vor.u32 %v5042_v52, %v4586_v53 }
 0x26e   : > { %v2749_v4 = vpop.f32.mrf.mxu3  ;;  %5611 = vst [vmem:[%s6666_s11 + $0x40] sm:$0xff] %v5479_v34  }
 0x26f   : > { %v6778_v7 = vadd.f32 %v2749_v4, %v6716_v47  ;;  %v2253_v47 = vpop.f32.mrf.mxu2 }
 0x270   : > { %v1309_v10 = vpop.f32.mrf.mxu0 }
 0x271   : > { %v2159_v12 = vpop.f32.mrf.mxu1  ;;  %3478 = vmatpush.bf16.msra.mxu1 %v5100_v1 }
 0x272   : > { %v2249_v24 = vadd.f32 %v2248_v45, %v2159_v12 }
 0x273   : > { %1348 = vmatmul.bf16.gmra.mxu0 %v4900_v61  ;;  %2809 = vmatmul.bf16.gmra.mxu3 %v4437_v9 }
 0x274   : > { %3441 = vmatmul.bf16.vlgmr.msrb.gmra.mxu1 %v4581_v11 }
 0x275   : > { %3479 = vmatpush.bf16.msra.mxu1 %v5099_v14 }
 0x276   : > { %v2752_v20 = vpop.f32.mrf.mxu3 }
 0x277   : > { %v6784_v21 = vadd.f32 %v2752_v20, %v6722_v62  ;;  %v2255_v32 = vpop.f32.mrf.mxu2  ;;  %v5047_v62 = vld [vmem:[%s6492_s6 + $0x34] sm:$0xf0] }
 0x278   : > { %v1311_v23 = vpop.f32.mrf.mxu0  ;;  %v4593_v42 = vor.u32 %v5047_v62, %v4592_v35 }
 0x279   : > { %v5219_v8 = vpack.c.bf16 %v1311_v23, %v1309_v10  ;;  %v2161_v25 = vpop.f32.mrf.mxu1  ;;  %3480 = vmatpush.bf16.msra.mxu1 %v5098_v19  ;;  %v4903_v10 = vld [vmem:[%s6468_s29 + $0xf8] sm:$0xff]  ;;  %s6027_s29 = sshra.s32 %s3555_s14, 4  ;;  %s6028_s29 = int_to_ptr.hbm [resolvable:$true] %s6027_s29 }
 0x27a   : > { %v2251_v27 = vadd.f32 %v2250_v0, %v2161_v25  ;;  %s6029_s16 = scalar_lea.hbm %s6028_s29, 128  ;;  %p6034_p10 = scmp.lt.s32.totalorder %s6028_s29, %s6964_s9 }
 0x27b   : > { %5560 = vst [vmem:[%s6546_s23 + $0xa0] sm:$0xff] %v5219_v8   ;;  %p6030_p4 = scmp.ne.s32.totalorder %s6028_s29, %s6029_s16  ;;  %p6035_p2 = scmp.lt.s32.totalorder %s6033_s13, %s6029_s16 }
 0x27c   : > { %v5484_v30 = vpack.c.bf16 %v2251_v27, %v2249_v24 }
 0x27d   : > { %3481 = vmatpush.bf16.msra.mxu1 %v5097_v26  ;;  %p6031_p1 = pnand %p6030_p4, %p6349_p3  ;;  %p6036_p13 = por %p6035_p2, %p6034_p10 }
 0x27e   : > { %v2754_v37 = vpop.f32.mrf.mxu3  ;;  %5612 = vst [vmem:[%s6666_s11 + $0x48] sm:$0xff] %v5484_v30  }
 0x27f   : > { %v6793_v38 = vadd.f32 %v2754_v37, %v6729_v17  ;;  %v2258_v44 = vpop.f32.mrf.mxu2  ;;  %p6032_p11 = pneg %p6031_p1 }
 0x280   : > { %v1314_v41 = vpop.f32.mrf.mxu0 }
 0x281   : > { %v2164_v43 = vpop.f32.mrf.mxu1  ;;  %3482 = vmatpush.bf16.msra.mxu1 %v5096_v33  ;;  %p6037_p8 = pnand %p6036_p13, %p6032_p11 }
 0x282   : > { %v2254_v48 = vadd.f32 %v2253_v47, %v2164_v43 }
 0x283   : > { %1353 = vmatmul.bf16.gmra.mxu0 %v4901_v39  ;;  %3427 = vmatmul.bf16.vlgmr.msrb.gmra.mxu3 %v4577_v40 }
 0x284   : > { %3483 = vmatmul.bf16.vlgmr.msra.gmra.mxu1 %v4593_v42 }
 0x286   : > { %v2766_v45 = vpop.f32.mrf.mxu3 }
 0x287   : > { %v6797_v22 = vadd.f32 %v2766_v45, %v6738_v36  ;;  %v2260_v55 = vpop.f32.mrf.mxu2 }
 0x288   : > { %v1316_v17 = vpop.f32.mrf.mxu0 }
 0x289   : > { %v5224_v46 = vpack.c.bf16 %v1316_v17, %v1314_v41  ;;  %v2166_v49 = vpop.f32.mrf.mxu1 }
 0x28a   : > { %v2256_v51 = vadd.f32 %v2255_v32, %v2166_v49 }
 0x28b   : > { %5561 = vst [vmem:[%s6546_s23 + $0xa8] sm:$0xff] %v5224_v46  }
 0x28c   : > { %v5489_v54 = vpack.c.bf16 %v2256_v51, %v2254_v48 }
 0x28e   : > { %v6802_v56 = vpop.f32.mrf.mxu3  ;;  %5613 = vst [vmem:[%s6666_s11 + $0x50] sm:$0xff] %v5489_v54  }
 0x28f   : > { %v2263_v63 = vpop.f32.mrf.mxu2  ;;  %v2769_v46 = vadd.f32 %v6802_v56, %v6749_v58 }
 0x290   : > { %v1319_v60 = vpop.f32.mrf.mxu0 }
 0x291   : > { %v2169_v36 = vpop.f32.mrf.mxu1 }
 0x292   : > { %v2259_v2 = vadd.f32 %v2258_v44, %v2169_v36 }
 0x293   : > { %1358 = vmatmul.bf16.gmra.mxu0 %v4902_v57  ;;  %3469 = vmatmul.bf16.vlgmr.msra.gmra.mxu3 %v4589_v59 }
 0x296   : > { %v2771_v34 = vpop.f32.mrf.mxu3 }
 0x297   : > { %v6807_v0 = vadd.f32 %v2771_v34, %v6753_v13  ;;  %v2265_v61 = vpop.f32.mrf.mxu2 }
 0x298   : > { %v1321_v1 = vpop.f32.mrf.mxu0 }
 0x299   : > { %v5229_v3 = vpack.c.bf16 %v1321_v1, %v1319_v60  ;;  %v2171_v4 = vpop.f32.mrf.mxu1 }
 0x29a   : > { %v2261_v5 = vadd.f32 %v2260_v55, %v2171_v4 }
 0x29b   : > { %5562 = vst [vmem:[%s6546_s23 + $0xb0] sm:$0xff] %v5229_v3  }
 0x29c   : > { %v5494_v6 = vpack.c.bf16 %v2261_v5, %v2259_v2 }
 0x29e   : > { %v6810_v9 = vpop.f32.mrf.mxu3  ;;  %5614 = vst [vmem:[%s6666_s11 + $0x58] sm:$0xff] %v5494_v6  }
 0x29f   : > { %v2268_v14 = vpop.f32.mrf.mxu2  ;;  %v2774_v1 = vadd.f32 %v6810_v9, %v6763_v31 }
 0x2a0   : > { %v1324_v11 = vpop.f32.mrf.mxu0 }
 0x2a1   : > { %v2174_v12 = vpop.f32.mrf.mxu1 }
 0x2a2   : > { %v2264_v18 = vadd.f32 %v2263_v63, %v2174_v12 }
 0x2a3   : > { %1363 = vmatmul.bf16.gmra.mxu0 %v4903_v10 }
 0x2a6   : > { %v2776_v13 = vpop.f32.mrf.mxu3 }
 0x2a7   : > { %v6815_v15 = vadd.f32 %v2776_v13, %v6769_v50  ;;  %v2270_v8 = vpop.f32.mrf.mxu2 }
 0x2a8   : > { %v1326_v16 = vpop.f32.mrf.mxu0 }
 0x2a9   : > { %v5234_v47 = vpack.c.bf16 %v1326_v16, %v1324_v11  ;;  %v2176_v19 = vpop.f32.mrf.mxu1 }
 0x2aa   : > { %v2266_v20 = vadd.f32 %v2265_v61, %v2176_v19 }
 0x2ab   : > { %5563 = vst [vmem:[%s6546_s23 + $0xb8] sm:$0xff] %v5234_v47  }
 0x2ac   : > { %v5499_v23 = vpack.c.bf16 %v2266_v20, %v2264_v18 }
 0x2ae   : > { %v6818_v24 = vpop.f32.mrf.mxu3  ;;  %5615 = vst [vmem:[%s6666_s11 + $0x60] sm:$0xff] %v5499_v23  }
 0x2af   : > { %v2273_v33 = vpop.f32.mrf.mxu2 }
 0x2b0   : > { %v1329_v25 = vpop.f32.mrf.mxu0 }
 0x2b1   : > { %v2179_v26 = vpop.f32.mrf.mxu1 }
 0x2b2   : > { %v2269_v29 = vadd.f32 %v2268_v14, %v2179_v26 }
 0x2b6   : > { %v2781_v27 = vpop.f32.mrf.mxu3 }
 0x2b7   : > { %v6822_v28 = vadd.f32 %v2781_v27, %v6784_v21  ;;  %v2275_v41 = vpop.f32.mrf.mxu2 }
 0x2b8   : > { %v1331_v50 = vpop.f32.mrf.mxu0 }
 0x2b9   : > { %v5239_v30 = vpack.c.bf16 %v1331_v50, %v1329_v25  ;;  %v2181_v32 = vpop.f32.mrf.mxu1 }
 0x2ba   : > { %v2271_v35 = vadd.f32 %v2270_v8, %v2181_v32 }
 0x2bb   : > { %5564 = vst [vmem:[%s6546_s23 + $0xc0] sm:$0xff] %v5239_v30  }
 0x2bc   : > { %v5504_v62 = vpack.c.bf16 %v2271_v35, %v2269_v29 }
 0x2be   : > { %v6825_v37 = vpop.f32.mrf.mxu3  ;;  %5616 = vst [vmem:[%s6666_s11 + $0x68] sm:$0xff] %v5504_v62  }
 0x2bf   : > { %v2278_v49 = vpop.f32.mrf.mxu2 }
 0x2c0   : > { %v1334_v39 = vpop.f32.mrf.mxu0 }
 0x2c1   : > { %v2184_v40 = vpop.f32.mrf.mxu1 }
 0x2c2   : > { %v2274_v43 = vadd.f32 %v2273_v33, %v2184_v40 }
 0x2c6   : > { %v2795_v42 = vpop.f32.mrf.mxu3 }
 0x2c7   : > { %v2796_v52 = vadd.f32 %v2795_v42, %v6797_v22  ;;  %v2280_v58 = vpop.f32.mrf.mxu2 }
 0x2c8   : > { %v1336_v21 = vpop.f32.mrf.mxu0 }
 0x2c9   : > { %v5244_v44 = vpack.c.bf16 %v1336_v21, %v1334_v39  ;;  %v2186_v45 = vpop.f32.mrf.mxu1 }
 0x2ca   : > { %v2276_v17 = vadd.f32 %v2275_v41, %v2186_v45 }
 0x2cb   : > { %5565 = vst [vmem:[%s6546_s23 + $0xc8] sm:$0xff] %v5244_v44  }
 0x2cc   : > { %v5509_v48 = vpack.c.bf16 %v2276_v17, %v2274_v43 }
 0x2ce   : > { %v2797_v51 = vpop.f32.mrf.mxu3  ;;  %5617 = vst [vmem:[%s6666_s11 + $0x70] sm:$0xff] %v5509_v48  }
 0x2cf   : > { %v2798_v53 = vadd.f32 %v2797_v51, %v2769_v46 }
 0x2d0   : > { %v1339_v54 = vpop.f32.mrf.mxu0 }
 0x2d1   : > { %v5519_v55 = vpack.c.bf16 %v2798_v53, %v2796_v52  ;;  %v2189_v57 = vpop.f32.mrf.mxu1 }
 0x2d2   : > { %v2279_v22 = vadd.f32 %v2278_v49, %v2189_v57 }
 0x2d3   : > { %5520 = vst [vmem:[%s6834_s26] sm:$0xff] %v5519_v55  }
 0x2d6   : > { %v2800_v59 = vpop.f32.mrf.mxu3 }
 0x2d7   : > { %v2801_v3 = vadd.f32 %v2800_v59, %v6807_v0 }
 0x2d8   : > { %v1341_v56 = vpop.f32.mrf.mxu0 }
 0x2d9   : > { %v5249_v60 = vpack.c.bf16 %v1341_v56, %v1339_v54  ;;  %v2191_v36 = vpop.f32.mrf.mxu1 }
 0x2da   : > { %v2281_v63 = vadd.f32 %v2280_v58, %v2191_v36 }
 0x2db   : > { %5566 = vst [vmem:[%s6546_s23 + $0xd0] sm:$0xff] %v5249_v60  }
 0x2dc   : > { %v5514_v34 = vpack.c.bf16 %v2281_v63, %v2279_v22 }
 0x2de   : > { %v2802_v2 = vpop.f32.mrf.mxu3  ;;  %5618 = vst [vmem:[%s6666_s11 + $0x78] sm:$0xff] %v5514_v34  }
 0x2df   : > { %v2803_v4 = vadd.f32 %v2802_v2, %v2774_v1 }
 0x2e0   : > { %6040 = shalt.err (!%p6037_p8)
}
 0x2e1   : > { %s6205_s1 = smov 64   ;;  %s6206_s6 = smov 4   ;;  %v1344_v31 = vpop.f32.mrf.mxu0  ;;  %v5524_v0 = vpack.c.bf16 %v2803_v4, %v2801_v3  ;;  %v2779_v9 = vadd.f32 %v6818_v24, %v6778_v7  ;;  %v3400_v11 = vpop.f32.mrf.mxu1 }
 0x2e2   : > { %5671 = dma.vmem_to_hbm [thread:$0]  (%p6349_p3), %s3553_s17, 2048, %s3555_s14, %s3513_s24, %s6205_s1, %s6205_s1, %s6206_s6   ;;  %v3414_v18 = vpop.f32.mrf.mxu2 }
 0x2e3   : > { %5619 = vst [vmem:[%s6834_s26 + $0x8] sm:$0xff] %v5524_v0   ;;  %s5114_s11 = sshll.u32 %s6288_s21, 5  ;;  %s3569_s25 = sshll.u32 %s6834_s26, 4  ;;  %s3570_s25 = int_to_ptr.vmem [resolvable:$true] %s3569_s25 }
 0x2e4   : > { %s3568_s7 = scalar_lea.hbm %s6965_s10, %s5114_s11  ;;  %s6061_s12 = scalar_lea.hbm %s6965_s10, 64 }
 0x2e5   : > { %s3571_s8 = sshll.u32 %s3568_s7, 4  ;;  %s3572_s8 = int_to_ptr.hbm [resolvable:$true] %s3571_s8 }
 0x2e6   : > { %v2805_v5 = vpop.f32.mrf.mxu3  ;;  %s6055_s17 = sshra.s32 %s3572_s8, 4  ;;  %s6056_s17 = int_to_ptr.hbm [resolvable:$true] %s6055_s17 }
 0x2e7   : > { %v2806_v12 = vadd.f32 %v2805_v5, %v6815_v15  ;;  %v2784_v15 = vadd.f32 %v6825_v37, %v6793_v38  ;;  %s6057_s14 = scalar_lea.hbm %s6056_s17, 32  ;;  %p6062_p5 = scmp.lt.s32.totalorder %s6056_s17, %s6965_s10 }
 0x2e8   : > { %p6058_p9 = scmp.ne.s32.totalorder %s6056_s17, %s6057_s14  ;;  %p6063_p7 = scmp.lt.s32.totalorder %s6061_s12, %s6057_s14 }
 0x2e9   : > { %v1346_v6 = vpop.f32.mrf.mxu0  ;;  %v3402_v20 = vpop.f32.mrf.mxu1 }
 0x2ea   : > { %v5254_v61 = vpack.c.bf16 %v1346_v6, %v1344_v31  ;;  %v3416_v7 = vpop.f32.mrf.mxu2  ;;  %p6059_p12 = pnand %p6058_p9, %p6349_p3  ;;  %p6064_p4 = por %p6063_p7, %p6062_p5 }
 0x2ec   : > { %5567 = vst [vmem:[%s6546_s23 + $0xd8] sm:$0xff] %v5254_v61   ;;  %p6060_p0 = pneg %p6059_p12 }
 0x2ee   : > { %v2807_v10 = vpop.f32.mrf.mxu3  ;;  %p6065_p1 = pnand %p6064_p4, %p6060_p0 }
 0x2ef   : > { %v2808_v14 = vadd.f32 %v2807_v10, %v2779_v9 }
 0x2f1   : > { %v1349_v13 = vpop.f32.mrf.mxu0  ;;  %v5529_v16 = vpack.c.bf16 %v2808_v14, %v2806_v12  ;;  %v3442_v50 = vpop.f32.mrf.mxu1 }
 0x2f2   : > { %v3456_v29 = vpop.f32.mrf.mxu2 }
 0x2f3   : > { %5620 = vst [vmem:[%s6834_s26 + $0x10] sm:$0xff] %v5529_v16  }
 0x2f6   : > { %v2810_v47 = vpop.f32.mrf.mxu3 }
 0x2f7   : > { %v2811_v8 = vadd.f32 %v2810_v47, %v6822_v28 }
 0x2f9   : > { %v1351_v19 = vpop.f32.mrf.mxu0 }
 0x2fa   : > { %v5259_v23 = vpack.c.bf16 %v1351_v19, %v1349_v13 }
 0x2fc   : > { %5568 = vst [vmem:[%s6546_s23 + $0xe0] sm:$0xff] %v5259_v23  }
 0x2fe   : > { %v2812_v24 = vpop.f32.mrf.mxu3 }
 0x2ff   : > { %v2813_v25 = vadd.f32 %v2812_v24, %v2784_v15 }
 0x301   : > { %v1354_v26 = vpop.f32.mrf.mxu0  ;;  %v5534_v27 = vpack.c.bf16 %v2813_v25, %v2811_v8 }
 0x303   : > { %5621 = vst [vmem:[%s6834_s26 + $0x18] sm:$0xff] %v5534_v27  }
 0x304   : > { %6068 = shalt.err (!%p6065_p1)
}
 0x305   : > { %5672 = dma.vmem_to_hbm [thread:$0]  (%p6349_p3), %s3570_s25, 512, %s3572_s8, %s3513_s24, %s6205_s1, %s6205_s1, %s6206_s6   ;;  %v3444_v32 = vpop.f32.mrf.mxu1  ;;  %v3458_v35 = vpop.f32.mrf.mxu2  ;;  %v3415_v62 = vadd.f32 %v3414_v18, %v3400_v11  ;;  %v3417_v40 = vadd.f32 %v3416_v7, %v3402_v20 }
 0x306   : > { %v3428_v38 = vpop.f32.mrf.mxu3  ;;  %s5115_s28 = sshll.u32 %s6288_s21, 3  ;;  %s3893_s26 = sshll.u32 %s6462_s4, 3 }
 0x307   : > { %v3429_v39 = vadd.f32 %v3428_v38, %v3415_v62  ;;  %s7013_s15 = sld [smem:[#allocation42_spill]]  ;;  %s5112_s19 = sshll.u32 %s6288_s21, 9 }
 0x308   : > { %s623_s5 = scalar_lea.vmem [#allocation20], %s3893_s26  ;;  %s7014_s14 = sld [smem:[#allocation41_spill]] }
 0x309   : > { %v1356_v28 = vpop.f32.mrf.mxu0  ;;  %v3443_v41 = vadd.f32 %v3442_v50, %v3429_v39  ;;  %s3586_s7 = sshll.u32 %s623_s5, 4  ;;  %s3535_s16 = sshll.u32 %s6546_s23, 4  ;;  %s3587_s7 = int_to_ptr.vmem [resolvable:$true] %s3586_s7  ;;  %s3536_s16 = int_to_ptr.vmem [resolvable:$true] %s3535_s16 }
 0x30a   : > { %v5264_v30 = vpack.c.bf16 %v1356_v28, %v1354_v26  ;;  %s3523_s21 = scalar_lea.sflag [#allocation21], %s6462_s4 }
 0x30b   : > { %v3457_v17 = vadd.f32 %v3456_v29, %v3443_v41 }
 0x30c   : > { %5569 = vst [vmem:[%s6546_s23 + $0xe8] sm:$0xff] %v5264_v30  }
 0x30d   : > { %v3484_v21 = vpop.f32.mrf.mxu1  ;;  %v3498_v44 = vpop.f32.mrf.mxu2  ;;  %s3585_s11 = scalar_lea.hbm %s7013_s15, %s5115_s28  ;;  %s6089_s24 = scalar_lea.hbm %s7013_s15, 16 }
 0x30e   : > { %v3430_v33 = vpop.f32.mrf.mxu3  ;;  %s3588_s25 = sshll.u32 %s3585_s11, 4  ;;  %s3534_s29 = scalar_lea.hbm %s7014_s14, %s5112_s19  ;;  %s3589_s25 = int_to_ptr.hbm [resolvable:$true] %s3588_s25 }
 0x30f   : > { %v3431_v42 = vadd.f32 %v3430_v33, %v3417_v40  ;;  %s3537_s12 = sshll.u32 %s3534_s29, 4  ;;  %s6083_s22 = sshra.s32 %s3589_s25, 4  ;;  %s6084_s22 = int_to_ptr.hbm [resolvable:$true] %s6083_s22  ;;  %s3538_s12 = int_to_ptr.hbm [resolvable:$true] %s3537_s12 }
 0x310   : > { %s6085_s13 = scalar_lea.hbm %s6084_s22, 8  ;;  %p6090_p13 = scmp.lt.s32.totalorder %s6084_s22, %s7013_s15 }
 0x311   : > { %v1359_v37 = vpop.f32.mrf.mxu0  ;;  %v3445_v48 = vadd.f32 %v3444_v32, %v3431_v42  ;;  %p6086_p11 = scmp.ne.s32.totalorder %s6084_s22, %s6085_s13  ;;  %p6091_p8 = scmp.lt.s32.totalorder %s6089_s24, %s6085_s13 }
 0x313   : > { %v3459_v51 = vadd.f32 %v3458_v35, %v3445_v48  ;;  %p6087_p10 = pnand %p6086_p11, %p6349_p3  ;;  %p6092_p9 = por %p6091_p8, %p6090_p13 }
 0x315   : > { %v3486_v55 = vpop.f32.mrf.mxu1  ;;  %v3500_v58 = vpop.f32.mrf.mxu2  ;;  %p6088_p2 = pneg %p6087_p10 }
 0x316   : > { %v3470_v43 = vpop.f32.mrf.mxu3 }
 0x317   : > { %v3471_v49 = vadd.f32 %v3470_v43, %v3457_v17  ;;  %p6093_p12 = pnand %p6092_p9, %p6088_p2 }
 0x319   : > { %v1361_v45 = vpop.f32.mrf.mxu0  ;;  %v3485_v53 = vadd.f32 %v3484_v21, %v3471_v49 }
 0x31a   : > { %v5269_v46 = vpack.c.bf16 %v1361_v45, %v1359_v37 }
 0x31b   : > { %v3499_v56 = vadd.f32 %v3498_v44, %v3485_v53 }
 0x31c   : > { %5570 = vst [vmem:[%s6546_s23 + $0xf0] sm:$0xff] %v5269_v46  }
 0x31e   : > { %v3472_v52 = vpop.f32.mrf.mxu3 }
 0x31f   : > { %v3473_v54 = vadd.f32 %v3472_v52, %v3459_v51 }
 0x321   : > { %v1364_v57 = vpop.f32.mrf.mxu0  ;;  %v3487_v59 = vadd.f32 %v3486_v55, %v3473_v54 }
 0x323   : > { %v3501_v22 = vadd.f32 %v3500_v58, %v3487_v59 }
 0x325   : > { %v5539_v60 = vpack.c.bf16 %v3501_v22, %v3499_v56 }
 0x327   : > { %5540 = vst [vmem:[%s623_s5] sm:$0xff] %v5539_v60  }
 0x329   : > { %v1366_v36 = vpop.f32.mrf.mxu0 }
 0x32a   : > { %6096 = shalt.err (!%p6093_p12)
}
 0x32b   : > { %5673 = dma.vmem_to_hbm [thread:$0]  (%p6349_p3), %s3587_s7, 128, %s3589_s25, %s3523_s21, %s6205_s1, %s6205_s1, %s6206_s6   ;;  %v5274_v63 = vpack.c.bf16 %v1366_v36, %v1364_v57 }
 0x32c   : > { %s3508_s19 = scalar_lea.sflag [#allocation4], %s6462_s4  ;;  %s6111_s5 = sshra.s32 %s3538_s12, 4  ;;  %s6112_s5 = int_to_ptr.hbm [resolvable:$true] %s6111_s5 }
 0x32d   : > { %5571 = vst [vmem:[%s6546_s23 + $0xf8] sm:$0xff] %v5274_v63   ;;  %s6113_s8 = scalar_lea.hbm %s6112_s5, 512  ;;  %s6117_s22 = scalar_lea.hbm %s7014_s14, 1024 }
 0x32e   : > { %p6114_p0 = scmp.ne.s32.totalorder %s6112_s5, %s6113_s8  ;;  %p6118_p4 = scmp.lt.s32.totalorder %s6112_s5, %s7014_s14 }
 0x32f   : > { %p6119_p1 = scmp.lt.s32.totalorder %s6117_s22, %s6113_s8 }
 0x330   : > { %p6115_p5 = pnand %p6114_p0, %p6349_p3 }
 0x331   : > { %p6120_p11 = por %p6119_p1, %p6118_p4 }
 0x332   : > { %p6116_p7 = pneg %p6115_p5 }
 0x334   : > { %p6121_p10 = pnand %p6120_p11, %p6116_p7 }
 0x336   : > { %6124 = shalt.err (!%p6121_p10)
}
 0x337   : > { %5670 = dma.vmem_to_hbm [thread:$0]  (%p6349_p3), %s3536_s16, 8192, %s3538_s12, %s3508_s19, %s6205_s1, %s6205_s1, %s6206_s6  }
 0x338 PF: > { %s7015_s4 = sld [smem:[#allocation31_spill]]  ;;  %p7017_p2 = scmp.ge.s32.totalorder %s6191_s20, 2 }
 0x33a   : > { %p5705_p13 = pnand %p7017_p2, %p6304_p6 }
 0x33c   : > { %p5706_p8 = pneg %p5705_p13 }
 0x33e   : > { %s3603_s7 = sand.u32 1, %s7015_s4  }
 0x33f   : > { %s3604_s25 = scalar_lea.sflag [#allocation4], %s3603_s7 }
 0x340   : > { %6166 = dma.done.wait (%p5706_p8), %s3604_s25, 8192  }
 0x341   : > { %6168 = vsyncadd (%p5706_p8), %s3604_s25, 4294959104  ;;  %s7018_s21 = sadd.s32 4294967294, %s6191_s20  }
 0x342   : > { %s3613_s26 = sand.u32 1, %s7018_s21  }
 0x343   : > { %s3614_s27 = scalar_lea.sflag [#allocation18], %s3613_s26 }
 0x344   : > { %6170 = dma.done.wait (%p5706_p8), %s3614_s27, 2560  }
 0x345   : > { %6172 = vsyncadd (%p5706_p8), %s3614_s27, 4294964736  ;;  %s3634_s24 = scalar_lea.sflag [#allocation21], %s3603_s7 }
 0x346   : > { %6174 = dma.done.wait (%p5706_p8), %s3634_s24, 128  }
 0x347   : > { %6176 = vsyncadd (%p5706_p8), %s3634_s24, 4294967168  ;;  %s7019_s20 = sld [smem:[#allocation34_spill]]  ;;  %s7022_s17 = smov %s6183_s18 }
 0x348   : > { %s7020_s1 = sld [smem:[#allocation32_spill]] }
 0x349   : > { %s7021_s19 = sld [smem:[#allocation35_spill]] }
 0x34d   : > { %p39_p3 = scmp.ge.s32.totalorder %s7019_s20, 4  }
 0x34e   : > { %s7023_s18 = smov %s7020_s1 }
 0x34f   :  { %41 = sbr.rel (!%p39_p3) target bundleno = 23 (0x17), region = 199 }
 0x354   :  { %3640 = vsyncpa [#allocation3], 1 }
 0x355   :  { %3642 = vsyncpa [#allocation3 + $0x1], 1 }
 0x356   :  { %3643 = vsyncpa [#allocation6], 1 }
 0x357   :  { %3645 = vsyncpa [#allocation6 + $0x1], 1 }
 0x358   :  { %3646 = vsyncpa [#allocation9], 1 }
 0x359   :  { %3648 = vsyncpa [#allocation9 + $0x1], 1 }
 0x35a   :  { %3649 = vsyncpa [#allocation12], 1 }
 0x35b   :  { %3650 = vsyncpa [#allocation15], 1 }
 0x35c   :  { %3651 = vsyncpa [#allocation4], 1 }
 0x35d   :  { %3653 = vsyncpa [#allocation4 + $0x1], 1 }
 0x35e   :  { %3654 = vsyncpa [#allocation18], 1 }
 0x35f   :  { %3656 = vsyncpa [#allocation18 + $0x1], 1 }
 0x360   :  { %3657 = vsyncpa [#allocation21], 1 }
 0x361   :  { %3659 = vsyncpa [#allocation21 + $0x1], 1 }

</bundles_post_ra>
